<compile_context>
chip_gen: v7x
topology: tpu7x:2x2x1
jax: 0.10.0
libtpu: 0.0.40
codegen_flags: <defaults>
</compile_context>

<pallas_src>
from functools import partial

import jax
import jax.numpy as jnp
from jax import lax
from jax.experimental import pallas as pl
from jax.experimental.pallas import tpu as pltpu

EPS = 1e-5  # nn.LayerNorm default eps


def _layer_norm(x, w, b):
    mu = jnp.mean(x, axis=-1, keepdims=True)
    var = jnp.mean((x - mu) ** 2, axis=-1, keepdims=True)
    return (x - mu) * lax.rsqrt(var + EPS) * w + b


def _gelu_exact(x):
    # PyTorch nn.GELU() default: 0.5 * x * (1 + erf(x / sqrt(2)))
    return 0.5 * x * (1.0 + lax.erf(x * (1.0 / jnp.sqrt(2.0).astype(x.dtype))))


def transformer_block_kernel(x_ref,
                             ln1_w_ref, ln1_b_ref,
                             w_qkv_ref, b_qkv_ref,      # (H, E, 3D) bf16, (H, 1, 3D) f32
                             w_out_ref, b_out_ref,      # (H, D, E)  bf16, (1, E)     f32
                             ln2_w_ref, ln2_b_ref,
                             w1_ref, b1_ref,            # (C, E, CK) bf16, (C, 1, CK) f32
                             w2_ref, b2_ref,            # (C, CK, E) bf16, (1, E)     f32
                             o_ref,
                             act_ref, acc_ref, x1_ref,  # VMEM scratch
                             *, num_heads, mlp_chunks):
    S, E = x_ref.shape
    D = E // num_heads

    # ---- LayerNorm 1 -> bf16 activation staged in VMEM ----------------------
    act_ref[...] = _layer_norm(x_ref[...], ln1_w_ref[0],
                               ln1_b_ref[0]).astype(jnp.bfloat16)
    acc_ref[...] = jnp.zeros_like(acc_ref)

    # ---- multi-head self-attention (fori_loop over heads) -------------------
    # Per head: qkv projection (K=E full MXU depth, N=3D lanes), softmax(q k^T)
    # (1/sqrt(D) pre-folded into W_q / b_q), context, then the per-head
    # out-projection contribution is accumulated into the lane-dense (S,E)
    # f32 accumulator.  All dynamic indexing is on leading dims.
    def head_body(h, carry):
        xn = act_ref[...]                                           # (S, E) bf16
        qkv_h = jnp.dot(xn, w_qkv_ref[h],
                        preferred_element_type=jnp.float32) + b_qkv_ref[h]  # (S, 3D)
        qh = qkv_h[:, :D].astype(jnp.bfloat16)
        kh = qkv_h[:, D:2 * D].astype(jnp.bfloat16)
        vh = qkv_h[:, 2 * D:].astype(jnp.bfloat16)

        scores = lax.dot_general(qh, kh, (((1,), (1,)), ((), ())),
                                 preferred_element_type=jnp.float32)        # (S, S)
        scores = scores - jnp.max(scores, axis=-1, keepdims=True)
        p = jnp.exp(scores)
        p = p * pl.reciprocal(jnp.sum(p, axis=-1, keepdims=True))   # exact recip
        ctx = jnp.dot(p.astype(jnp.bfloat16), vh,
                      preferred_element_type=jnp.float32)                   # (S, D)
        acc_ref[...] += jnp.dot(ctx.astype(jnp.bfloat16), w_out_ref[h],
                                preferred_element_type=jnp.float32)         # (S, E)
        return carry

    lax.fori_loop(0, num_heads, head_body, 0)

    # ---- residual 1 (from the un-normalized input) ---------------------------
    x1_ref[...] = x_ref[...] + acc_ref[...] + b_out_ref[0]

    # ---- LayerNorm 2 + MLP tiled over the 4E hidden dim ----------------------
    act_ref[...] = _layer_norm(x1_ref[...], ln2_w_ref[0],
                               ln2_b_ref[0]).astype(jnp.bfloat16)
    acc_ref[...] = jnp.zeros_like(acc_ref)

    def mlp_body(c, carry):
        xn2 = act_ref[...]                                          # (S, E) bf16
        h1 = jnp.dot(xn2, w1_ref[c],
                     preferred_element_type=jnp.float32) + b1_ref[c]        # (S, CK)
        h1 = _gelu_exact(h1)                                        # exact erf, f32
        acc_ref[...] += jnp.dot(h1.astype(jnp.bfloat16), w2_ref[c],
                                preferred_element_type=jnp.float32)         # (S, E)
        return carry

    lax.fori_loop(0, mlp_chunks, mlp_body, 0)

    # ---- residual 2 -----------------------------------------------------------
    o_ref[...] = (x1_ref[...] + acc_ref[...] + b2_ref[0]).astype(o_ref.dtype)


def _mlp_chunk_size(h4, cap=256):
    """Largest divisor of 4E that is <= cap, preferring multiples of 128."""
    if h4 <= cap:
        return h4
    for c in range(cap - cap % 128, 0, -128):
        if c > 0 and h4 % c == 0:
            return c
    for c in range(cap, 0, -1):
        if h4 % c == 0:
            return c
    return h4


def _vmem_limit_bytes():
    cap = None
    try:
        cap = getattr(pltpu.get_tpu_info(), "vmem_capacity_bytes", None)
    except Exception:
        cap = None
    if not cap:
        cap = 64 * 1024 * 1024            # conservative default (v7x per-core VMEM)
    return int(min(cap * 3 // 4, 100 * 1024 * 1024))


def _make_call(B, S, E, D, num_heads, CK, C, out_dtype, use_buffered, vmem_limit):
    def const_spec(shape):
        nd = len(shape)
        index_map = lambda b, _nd=nd: (0,) * _nd
        if use_buffered:
            # Grid-invariant blocks: single-buffered (halves weight VMEM).
            return pl.BlockSpec(shape, index_map, pipeline_mode=pl.Buffered(1))
        return pl.BlockSpec(shape, index_map)

    H = num_heads
    H4 = C * CK
    in_specs = [
        pl.BlockSpec((None, S, E), lambda b: (b, 0, 0)),        # x (leading dim squeezed)
        const_spec((1, E)), const_spec((1, E)),                 # ln1 w, b
        const_spec((H, E, 3 * D)), const_spec((H, 1, 3 * D)),   # qkv W (head-major), b
        const_spec((H, D, E)), const_spec((1, E)),              # out-proj W (head-major), b
        const_spec((1, E)), const_spec((1, E)),                 # ln2 w, b
        const_spec((C, E, CK)), const_spec((C, 1, CK)),         # fc1 W (chunked), b
        const_spec((C, CK, E)), const_spec((1, E)),             # fc2 W (chunked), b
    ]

    flops = B * (24 * S * E * E + 4 * S * S * E)
    transcendentals = B * (num_heads * S * S + 4 * S * E)
    bytes_accessed = (2 * B * S * E * 4            # x in + out (f32)
                      + 2 * 12 * E * E             # bf16 weights (~12 E^2 params)
                      + 4 * (3 * E + E + H4 + 5 * E))

    return pl.pallas_call(
        partial(transformer_block_kernel, num_heads=num_heads, mlp_chunks=C),
        out_shape=jax.ShapeDtypeStruct((B, S, E), out_dtype),
        grid_spec=pltpu.PrefetchScalarGridSpec(
            num_scalar_prefetch=0,
            grid=(B,),
            in_specs=in_specs,
            out_specs=pl.BlockSpec((None, S, E), lambda b: (b, 0, 0)),
            scratch_shapes=[pltpu.VMEM((S, E), jnp.bfloat16),   # LN1/LN2 activation
                            pltpu.VMEM((S, E), jnp.float32),    # attn / MLP accumulator
                            pltpu.VMEM((S, E), jnp.float32)],   # residual-1 (x1)
        ),
        compiler_params=pltpu.CompilerParams(
            dimension_semantics=("parallel",),
            vmem_limit_bytes=vmem_limit,
        ),
        cost_estimate=pl.CostEstimate(flops=flops,
                                      transcendentals=transcendentals,
                                      bytes_accessed=bytes_accessed),
    )


def transformer_block(x, params, num_heads):
    """x: (B, S, E) f32; params in PyTorch layout (see reference_block)."""
    (ln1_w, ln1_b, w_in, b_in, w_out, b_out,
     ln2_w, ln2_b, w1, b1, w2, b2) = [jnp.asarray(p) for p in params]
    B, S, E = x.shape
    H = num_heads
    assert E % H == 0, "embedding_dim must be divisible by heads"
    D = E // H
    H4 = w1.shape[0]
    CK = _mlp_chunk_size(H4)
    C = H4 // CK
    scale = 1.0 / float(D) ** 0.5

    # --- attention weights: head-major layout, 1/sqrt(D) folded into Q -------
    w_qkv = w_in.T.reshape(E, 3, H, D).transpose(2, 0, 1, 3).reshape(H, E, 3 * D)
    b_qkv = b_in.reshape(3, H, D).transpose(1, 0, 2).reshape(H, 1, 3 * D)
    w_qkv = w_qkv.at[:, :, :D].multiply(scale).astype(jnp.bfloat16)
    b_qkv = b_qkv.at[:, :, :D].multiply(scale)
    w_out_h = w_out.T.reshape(H, D, E).astype(jnp.bfloat16)

    # --- MLP weights: chunk-major layout over the 4E hidden dim --------------
    w1_c = w1.T.reshape(E, C, CK).transpose(1, 0, 2).astype(jnp.bfloat16)   # (C, E, CK)
    b1_c = b1.reshape(C, 1, CK)
    w2_c = w2.T.reshape(C, CK, E).astype(jnp.bfloat16)                      # (C, CK, E)

    vmem_limit = _vmem_limit_bytes()
    args = (x, ln1_w, ln1_b, w_qkv, b_qkv, w_out_h, b_out,
            ln2_w, ln2_b, w1_c, b1_c, w2_c, b2)

    try:
        out = _make_call(B, S, E, D, H, CK, C, x.dtype, True, vmem_limit)(*args)
        return jax.block_until_ready(out)
    except Exception:
        # pipeline_mode=pl.Buffered(1) unsupported in this JAX build: rebuild
        # with plain (double-buffered) weight specs.  A genuinely unrelated
        # trace/compile error reproduces below and still surfaces to the caller.
        return _make_call(B, S, E, D, H, CK, C, x.dtype, False, vmem_limit)(*args)


# ---------------------------------------------------------------------------
# Pure-JAX f32 reference (PyTorch semantics) for a correctness check.
# ---------------------------------------------------------------------------
def reference_block(x, params, num_heads):
    (ln1_w, ln1_b, w_in, b_in, w_out, b_out,
     ln2_w, ln2_b, w1, b1, w2, b2) = params
    B, S, E = x.shape
    hd = E // num_heads

    def ln(v, w, b):
        mu = jnp.mean(v, -1, keepdims=True)
        var = jnp.mean((v - mu) ** 2, -1, keepdims=True)
        return (v - mu) / jnp.sqrt(var + EPS) * w[0] + b[0]

    xn = ln(x, ln1_w, ln1_b)
    qkv = xn @ w_in.T + b_in[0]
    q, k, v = qkv[..., :E], qkv[..., E:2 * E], qkv[..., 2 * E:]
    q = q.reshape(B, S, num_heads, hd).transpose(0, 2, 1, 3)
    k = k.reshape(B, S, num_heads, hd).transpose(0, 2, 1, 3)
    v = v.reshape(B, S, num_heads, hd).transpose(0, 2, 1, 3)
    s = jnp.einsum("bhqd,bhkd->bhqk", q, k) / jnp.sqrt(float(hd))
    p = jax.nn.softmax(s, axis=-1)
    o = jnp.einsum("bhqk,bhkd->bhqd", p, v).transpose(0, 2, 1, 3).reshape(B, S, E)
    o = o @ w_out.T + b_out[0]
    x1 = x + o
    xn2 = ln(x1, ln2_w, ln2_b)
    h = jax.nn.gelu(xn2 @ w1.T + b1[0], approximate=False)
    return x1 + (h @ w2.T + b2[0])


if __name__ == "__main__":
    B, S, E, HEADS = 2, 16, 128, 4
    H4 = 4 * E

    key = jax.random.PRNGKey(0)
    ks = jax.random.split(key, 13)

    def nrm(k, shape, scale=0.05):
        return scale * jax.random.normal(k, shape, jnp.float32)

    x = jax.random.normal(ks[0], (B, S, E), jnp.float32)

    params = (
        1.0 + nrm(ks[1], (1, E)),        # ln1 weight
        nrm(ks[2], (1, E)),              # ln1 bias
        nrm(ks[3], (3 * E, E)),          # attention in_proj_weight
        nrm(ks[4], (1, 3 * E)),          # attention in_proj_bias
        nrm(ks[5], (E, E)),              # attention out_proj.weight
        nrm(ks[6], (1, E)),              # attention out_proj.bias
        1.0 + nrm(ks[7], (1, E)),        # ln2 weight
        nrm(ks[8], (1, E)),              # ln2 bias
        nrm(ks[9], (H4, E)),             # mlp fc1 weight
        nrm(ks[10], (1, H4)),            # mlp fc1 bias
        nrm(ks[11], (E, H4)),            # mlp fc2 weight
        nrm(ks[12], (1, E)),             # mlp fc2 bias
    )

    out = jax.block_until_ready(transformer_block(x, params, HEADS))
    ref = reference_block(x, params, HEADS)

    assert out.shape == (B, S, E)
    assert bool(jnp.all(jnp.isfinite(out)))
    # Tolerance accounts for bf16 MXU operands vs the f32 reference.
    err = float(jnp.max(jnp.abs(out - ref)))
    assert bool(jnp.allclose(out, ref, rtol=2e-2, atol=2e-2)), f"max abs diff {err}"

    print("KERNEL_OK")
</pallas_src>

<mosaic_0001>
module attributes {stable_mosaic.version = 11 : i64} {
  func.func @transformer_block_kernel(%arg0: i32, %arg1: memref<1x16x128xf32, #tpu.memory_space<vmem>>, %arg2: memref<1x128xf32, #tpu.memory_space<vmem>>, %arg3: memref<1x128xf32, #tpu.memory_space<vmem>>, %arg4: memref<4x128x96xbf16, #tpu.memory_space<vmem>>, %arg5: memref<4x1x96xf32, #tpu.memory_space<vmem>>, %arg6: memref<4x32x128xbf16, #tpu.memory_space<vmem>>, %arg7: memref<1x128xf32, #tpu.memory_space<vmem>>, %arg8: memref<1x128xf32, #tpu.memory_space<vmem>>, %arg9: memref<1x128xf32, #tpu.memory_space<vmem>>, %arg10: memref<2x128x256xbf16, #tpu.memory_space<vmem>>, %arg11: memref<2x1x256xf32, #tpu.memory_space<vmem>>, %arg12: memref<2x256x128xbf16, #tpu.memory_space<vmem>>, %arg13: memref<1x128xf32, #tpu.memory_space<vmem>>, %arg14: memref<1x16x128xf32, #tpu.memory_space<vmem>>, %arg15: memref<16x128xbf16, #tpu.memory_space<vmem>>, %arg16: memref<16x128xf32, #tpu.memory_space<vmem>>, %arg17: memref<16x128xf32, #tpu.memory_space<vmem>>) attributes {dimension_semantics = [#tpu.dimension_semantics<parallel>], iteration_bounds = array<i64: 2>, scalar_prefetch = 0 : i64, scratch_operands = 3 : i64, tpu.core_type = #tpu.core_type<tc>, window_params = [{transform_indices = @transform_0, window_bounds = array<i64: 1, 16, 128>}, {pipeline_mode = #tpu.pipeline_mode<synchronous>, transform_indices = @transform_1, window_bounds = array<i64: 1, 128>}, {pipeline_mode = #tpu.pipeline_mode<synchronous>, transform_indices = @transform_2, window_bounds = array<i64: 1, 128>}, {pipeline_mode = #tpu.pipeline_mode<synchronous>, transform_indices = @transform_3, window_bounds = array<i64: 4, 128, 96>}, {pipeline_mode = #tpu.pipeline_mode<synchronous>, transform_indices = @transform_4, window_bounds = array<i64: 4, 1, 96>}, {pipeline_mode = #tpu.pipeline_mode<synchronous>, transform_indices = @transform_5, window_bounds = array<i64: 4, 32, 128>}, {pipeline_mode = #tpu.pipeline_mode<synchronous>, transform_indices = @transform_6, window_bounds = array<i64: 1, 128>}, {pipeline_mode = #tpu.pipeline_mode<synchronous>, transform_indices = @transform_7, window_bounds = array<i64: 1, 128>}, {pipeline_mode = #tpu.pipeline_mode<synchronous>, transform_indices = @transform_8, window_bounds = array<i64: 1, 128>}, {pipeline_mode = #tpu.pipeline_mode<synchronous>, transform_indices = @transform_9, window_bounds = array<i64: 2, 128, 256>}, {pipeline_mode = #tpu.pipeline_mode<synchronous>, transform_indices = @transform_10, window_bounds = array<i64: 2, 1, 256>}, {pipeline_mode = #tpu.pipeline_mode<synchronous>, transform_indices = @transform_11, window_bounds = array<i64: 2, 256, 128>}, {pipeline_mode = #tpu.pipeline_mode<synchronous>, transform_indices = @transform_12, window_bounds = array<i64: 1, 128>}, {transform_indices = @transform_13, window_bounds = array<i64: 1, 16, 128>}]} {
    %c0 = arith.constant 0 : index
    %c0_0 = arith.constant 0 : index
    %c0_1 = arith.constant 0 : index
    %0 = vector.load %arg1[%c0, %c0_0, %c0_1] : memref<1x16x128xf32, #tpu.memory_space<vmem>>, vector<1x16x128xf32>
    %1 = vector.shape_cast %0 : vector<1x16x128xf32> to vector<16x128xf32>
    %c0_2 = arith.constant 0 : index
    %c0_3 = arith.constant 0 : index
    %2 = vector.load %arg2[%c0_2, %c0_3] : memref<1x128xf32, #tpu.memory_space<vmem>>, vector<1x128xf32>
    %3 = vector.shape_cast %2 : vector<1x128xf32> to vector<128xf32>
    %c0_4 = arith.constant 0 : index
    %c0_5 = arith.constant 0 : index
    %4 = vector.load %arg3[%c0_4, %c0_5] : memref<1x128xf32, #tpu.memory_space<vmem>>, vector<1x128xf32>
    %5 = vector.shape_cast %4 : vector<1x128xf32> to vector<128xf32>
    %cst = arith.constant dense<0.000000e+00> : vector<16xf32>
    %6 = vector.multi_reduction <add>, %1, %cst [1] : vector<16x128xf32> to vector<16xf32>
    %7 = vector.shape_cast %6 : vector<16xf32> to vector<16x1xf32>
    %cst_6 = arith.constant 1.280000e+02 : f32
    %8 = vector.broadcast %cst_6 : f32 to vector<16x1xf32>
    %9 = arith.divf %7, %8 : vector<16x1xf32>
    %10 = vector.broadcast %9 : vector<16x1xf32> to vector<16x128xf32>
    %11 = arith.subf %1, %10 : vector<16x128xf32>
    %12 = arith.mulf %11, %11 : vector<16x128xf32>
    %cst_7 = arith.constant dense<0.000000e+00> : vector<16xf32>
    %13 = vector.multi_reduction <add>, %12, %cst_7 [1] : vector<16x128xf32> to vector<16xf32>
    %14 = vector.shape_cast %13 : vector<16xf32> to vector<16x1xf32>
    %cst_8 = arith.constant 1.280000e+02 : f32
    %15 = vector.broadcast %cst_8 : f32 to vector<16x1xf32>
    %16 = arith.divf %14, %15 : vector<16x1xf32>
    %17 = vector.broadcast %9 : vector<16x1xf32> to vector<16x128xf32>
    %18 = arith.subf %1, %17 : vector<16x128xf32>
    %cst_9 = arith.constant 9.99999974E-6 : f32
    %19 = vector.broadcast %cst_9 : f32 to vector<16x1xf32>
    %20 = arith.addf %16, %19 : vector<16x1xf32>
    %21 = math.rsqrt %20 : vector<16x1xf32>
    %22 = vector.broadcast %21 : vector<16x1xf32> to vector<16x128xf32>
    %23 = arith.mulf %18, %22 : vector<16x128xf32>
    %24 = vector.shape_cast %3 : vector<128xf32> to vector<1x128xf32>
    %25 = vector.broadcast %24 : vector<1x128xf32> to vector<16x128xf32>
    %26 = arith.mulf %23, %25 : vector<16x128xf32>
    %27 = vector.shape_cast %5 : vector<128xf32> to vector<1x128xf32>
    %28 = vector.broadcast %27 : vector<1x128xf32> to vector<16x128xf32>
    %29 = arith.addf %26, %28 : vector<16x128xf32>
    %30 = arith.truncf %29 : vector<16x128xf32> to vector<16x128xbf16>
    %c0_10 = arith.constant 0 : index
    %c0_11 = arith.constant 0 : index
    %31 = vector.load %arg15[%c0_10, %c0_11] : memref<16x128xbf16, #tpu.memory_space<vmem>>, vector<16x128xbf16>
    tpu.vector_store %arg15[%c0_10, %c0_11], %30 {strides = array<i32>} : memref<16x128xbf16, #tpu.memory_space<vmem>>, vector<16x128xbf16>,
    %cst_12 = arith.constant 0.000000e+00 : f32
    %32 = vector.broadcast %cst_12 : f32 to vector<16x128xf32>
    %c0_13 = arith.constant 0 : index
    %c0_14 = arith.constant 0 : index
    %33 = vector.load %arg16[%c0_13, %c0_14] : memref<16x128xf32, #tpu.memory_space<vmem>>, vector<16x128xf32>
    tpu.vector_store %arg16[%c0_13, %c0_14], %32 {strides = array<i32>} : memref<16x128xf32, #tpu.memory_space<vmem>>, vector<16x128xf32>,
    %c0_i32 = arith.constant 0 : i32
    %c4_i32 = arith.constant 4 : i32
    %34 = arith.addi %c0_i32, %c4_i32 : i32
    %c1_i32 = arith.constant 1 : i32
    scf.for %arg18 = %c0_i32 to %34 step %c1_i32  : i32 {
      %c0_53 = arith.constant 0 : index
      %c0_54 = arith.constant 0 : index
      %90 = vector.load %arg15[%c0_53, %c0_54] : memref<16x128xbf16, #tpu.memory_space<vmem>>, vector<16x128xbf16>
      %91 = arith.index_cast %arg18 : i32 to index
      %c0_55 = arith.constant 0 : index
      %c0_56 = arith.constant 0 : index
      %92 = vector.load %arg4[%91, %c0_55, %c0_56] : memref<4x128x96xbf16, #tpu.memory_space<vmem>>, vector<1x128x96xbf16>
      %93 = vector.shape_cast %92 : vector<1x128x96xbf16> to vector<128x96xbf16>
      %cst_57 = arith.constant dense<0.000000e+00> : vector<16x96xf32>
      %94 = tpu.matmul %90, %93, %cst_57 {dimension_numbers = #tpu.dot_dimension_numbers<[1], [0], [0], [1], [0, 0, 1, 1], [], []>} : vector<16x128xbf16>, vector<128x96xbf16>, vector<16x96xf32> -> vector<16x96xf32>
      %95 = arith.index_cast %arg18 : i32 to index
      %c0_58 = arith.constant 0 : index
      %c0_59 = arith.constant 0 : index
      %96 = vector.load %arg5[%95, %c0_58, %c0_59] : memref<4x1x96xf32, #tpu.memory_space<vmem>>, vector<1x1x96xf32>
      %97 = vector.shape_cast %96 : vector<1x1x96xf32> to vector<1x96xf32>
      %98 = vector.broadcast %97 : vector<1x96xf32> to vector<16x96xf32>
      %99 = arith.addf %94, %98 : vector<16x96xf32>
      %100 = vector.extract_strided_slice %99 {offsets = [0, 0], sizes = [16, 32], strides = [1, 1]} : vector<16x96xf32> to vector<16x32xf32>
      %101 = arith.truncf %100 : vector<16x32xf32> to vector<16x32xbf16>
      %102 = vector.extract_strided_slice %99 {offsets = [0, 32], sizes = [16, 32], strides = [1, 1]} : vector<16x96xf32> to vector<16x32xf32>
      %103 = arith.truncf %102 : vector<16x32xf32> to vector<16x32xbf16>
      %104 = vector.extract_strided_slice %99 {offsets = [0, 64], sizes = [16, 32], strides = [1, 1]} : vector<16x96xf32> to vector<16x32xf32>
      %105 = arith.truncf %104 : vector<16x32xf32> to vector<16x32xbf16>
      %cst_60 = arith.constant dense<0.000000e+00> : vector<16x16xf32>
      %106 = tpu.matmul %101, %103, %cst_60 {dimension_numbers = #tpu.dot_dimension_numbers<[1], [1], [0], [0], [0, 0, 1, 0], [], []>} : vector<16x32xbf16>, vector<16x32xbf16>, vector<16x16xf32> -> vector<16x16xf32>
      %cst_61 = arith.constant dense<0xFF800000> : vector<16xf32>
      %107 = vector.multi_reduction <maximumf>, %106, %cst_61 [1] : vector<16x16xf32> to vector<16xf32>
      %108 = vector.shape_cast %107 : vector<16xf32> to vector<16x1xf32>
      %109 = vector.broadcast %108 : vector<16x1xf32> to vector<16x16xf32>
      %110 = arith.subf %106, %109 : vector<16x16xf32>
      %111 = math.exp %110 : vector<16x16xf32>
      %cst_62 = arith.constant dense<0.000000e+00> : vector<16xf32>
      %112 = vector.multi_reduction <add>, %111, %cst_62 [1] : vector<16x16xf32> to vector<16xf32>
      %113 = vector.shape_cast %112 : vector<16xf32> to vector<16x1xf32>
      %114 = tpu.reciprocal %113 : vector<16x1xf32> -> vector<16x1xf32>
      %115 = vector.broadcast %114 : vector<16x1xf32> to vector<16x16xf32>
      %116 = arith.mulf %111, %115 : vector<16x16xf32>
      %117 = arith.truncf %116 : vector<16x16xf32> to vector<16x16xbf16>
      %cst_63 = arith.constant dense<0.000000e+00> : vector<16x32xf32>
      %118 = tpu.matmul %117, %105, %cst_63 {dimension_numbers = #tpu.dot_dimension_numbers<[1], [0], [0], [1], [0, 0, 1, 1], [], []>} : vector<16x16xbf16>, vector<16x32xbf16>, vector<16x32xf32> -> vector<16x32xf32>
      %c0_64 = arith.constant 0 : index
      %c0_65 = arith.constant 0 : index
      %119 = vector.load %arg16[%c0_64, %c0_65] : memref<16x128xf32, #tpu.memory_space<vmem>>, vector<16x128xf32>
      %120 = arith.truncf %118 : vector<16x32xf32> to vector<16x32xbf16>
      %121 = arith.index_cast %arg18 : i32 to index
      %c0_66 = arith.constant 0 : index
      %c0_67 = arith.constant 0 : index
      %122 = vector.load %arg6[%121, %c0_66, %c0_67] : memref<4x32x128xbf16, #tpu.memory_space<vmem>>, vector<1x32x128xbf16>
      %123 = vector.shape_cast %122 : vector<1x32x128xbf16> to vector<32x128xbf16>
      %cst_68 = arith.constant dense<0.000000e+00> : vector<16x128xf32>
      %124 = tpu.matmul %120, %123, %cst_68 {dimension_numbers = #tpu.dot_dimension_numbers<[1], [0], [0], [1], [0, 0, 1, 1], [], []>} : vector<16x32xbf16>, vector<32x128xbf16>, vector<16x128xf32> -> vector<16x128xf32>
      %125 = arith.addf %119, %124 : vector<16x128xf32>
      %c0_69 = arith.constant 0 : index
      %c0_70 = arith.constant 0 : index
      %126 = vector.load %arg16[%c0_69, %c0_70] : memref<16x128xf32, #tpu.memory_space<vmem>>, vector<16x128xf32>
      tpu.vector_store %arg16[%c0_69, %c0_70], %125 {strides = array<i32>} : memref<16x128xf32, #tpu.memory_space<vmem>>, vector<16x128xf32>,
    }
    %c4_i32_15 = arith.constant 4 : i32
    %c0_16 = arith.constant 0 : index
    %c0_17 = arith.constant 0 : index
    %c0_18 = arith.constant 0 : index
    %35 = vector.load %arg1[%c0_16, %c0_17, %c0_18] : memref<1x16x128xf32, #tpu.memory_space<vmem>>, vector<1x16x128xf32>
    %36 = vector.shape_cast %35 : vector<1x16x128xf32> to vector<16x128xf32>
    %c0_19 = arith.constant 0 : index
    %c0_20 = arith.constant 0 : index
    %37 = vector.load %arg16[%c0_19, %c0_20] : memref<16x128xf32, #tpu.memory_space<vmem>>, vector<16x128xf32>
    %38 = arith.addf %36, %37 : vector<16x128xf32>
    %c0_21 = arith.constant 0 : index
    %c0_22 = arith.constant 0 : index
    %39 = vector.load %arg7[%c0_21, %c0_22] : memref<1x128xf32, #tpu.memory_space<vmem>>, vector<1x128xf32>
    %40 = vector.shape_cast %39 : vector<1x128xf32> to vector<128xf32>
    %41 = vector.shape_cast %40 : vector<128xf32> to vector<1x128xf32>
    %42 = vector.broadcast %41 : vector<1x128xf32> to vector<16x128xf32>
    %43 = arith.addf %38, %42 : vector<16x128xf32>
    %c0_23 = arith.constant 0 : index
    %c0_24 = arith.constant 0 : index
    %44 = vector.load %arg17[%c0_23, %c0_24] : memref<16x128xf32, #tpu.memory_space<vmem>>, vector<16x128xf32>
    tpu.vector_store %arg17[%c0_23, %c0_24], %43 {strides = array<i32>} : memref<16x128xf32, #tpu.memory_space<vmem>>, vector<16x128xf32>,
    %c0_25 = arith.constant 0 : index
    %c0_26 = arith.constant 0 : index
    %45 = vector.load %arg17[%c0_25, %c0_26] : memref<16x128xf32, #tpu.memory_space<vmem>>, vector<16x128xf32>
    %c0_27 = arith.constant 0 : index
    %c0_28 = arith.constant 0 : index
    %46 = vector.load %arg8[%c0_27, %c0_28] : memref<1x128xf32, #tpu.memory_space<vmem>>, vector<1x128xf32>
    %47 = vector.shape_cast %46 : vector<1x128xf32> to vector<128xf32>
    %c0_29 = arith.constant 0 : index
    %c0_30 = arith.constant 0 : index
    %48 = vector.load %arg9[%c0_29, %c0_30] : memref<1x128xf32, #tpu.memory_space<vmem>>, vector<1x128xf32>
    %49 = vector.shape_cast %48 : vector<1x128xf32> to vector<128xf32>
    %cst_31 = arith.constant dense<0.000000e+00> : vector<16xf32>
    %50 = vector.multi_reduction <add>, %45, %cst_31 [1] : vector<16x128xf32> to vector<16xf32>
    %51 = vector.shape_cast %50 : vector<16xf32> to vector<16x1xf32>
    %cst_32 = arith.constant 1.280000e+02 : f32
    %52 = vector.broadcast %cst_32 : f32 to vector<16x1xf32>
    %53 = arith.divf %51, %52 : vector<16x1xf32>
    %54 = vector.broadcast %53 : vector<16x1xf32> to vector<16x128xf32>
    %55 = arith.subf %45, %54 : vector<16x128xf32>
    %56 = arith.mulf %55, %55 : vector<16x128xf32>
    %cst_33 = arith.constant dense<0.000000e+00> : vector<16xf32>
    %57 = vector.multi_reduction <add>, %56, %cst_33 [1] : vector<16x128xf32> to vector<16xf32>
    %58 = vector.shape_cast %57 : vector<16xf32> to vector<16x1xf32>
    %cst_34 = arith.constant 1.280000e+02 : f32
    %59 = vector.broadcast %cst_34 : f32 to vector<16x1xf32>
    %60 = arith.divf %58, %59 : vector<16x1xf32>
    %61 = vector.broadcast %53 : vector<16x1xf32> to vector<16x128xf32>
    %62 = arith.subf %45, %61 : vector<16x128xf32>
    %cst_35 = arith.constant 9.99999974E-6 : f32
    %63 = vector.broadcast %cst_35 : f32 to vector<16x1xf32>
    %64 = arith.addf %60, %63 : vector<16x1xf32>
    %65 = math.rsqrt %64 : vector<16x1xf32>
    %66 = vector.broadcast %65 : vector<16x1xf32> to vector<16x128xf32>
    %67 = arith.mulf %62, %66 : vector<16x128xf32>
    %68 = vector.shape_cast %47 : vector<128xf32> to vector<1x128xf32>
    %69 = vector.broadcast %68 : vector<1x128xf32> to vector<16x128xf32>
    %70 = arith.mulf %67, %69 : vector<16x128xf32>
    %71 = vector.shape_cast %49 : vector<128xf32> to vector<1x128xf32>
    %72 = vector.broadcast %71 : vector<1x128xf32> to vector<16x128xf32>
    %73 = arith.addf %70, %72 : vector<16x128xf32>
    %74 = arith.truncf %73 : vector<16x128xf32> to vector<16x128xbf16>
    %c0_36 = arith.constant 0 : index
    %c0_37 = arith.constant 0 : index
    %75 = vector.load %arg15[%c0_36, %c0_37] : memref<16x128xbf16, #tpu.memory_space<vmem>>, vector<16x128xbf16>
    tpu.vector_store %arg15[%c0_36, %c0_37], %74 {strides = array<i32>} : memref<16x128xbf16, #tpu.memory_space<vmem>>, vector<16x128xbf16>,
    %cst_38 = arith.constant 0.000000e+00 : f32
    %76 = vector.broadcast %cst_38 : f32 to vector<16x128xf32>
    %c0_39 = arith.constant 0 : index
    %c0_40 = arith.constant 0 : index
    %77 = vector.load %arg16[%c0_39, %c0_40] : memref<16x128xf32, #tpu.memory_space<vmem>>, vector<16x128xf32>
    tpu.vector_store %arg16[%c0_39, %c0_40], %76 {strides = array<i32>} : memref<16x128xf32, #tpu.memory_space<vmem>>, vector<16x128xf32>,
    %c0_i32_41 = arith.constant 0 : i32
    %c2_i32 = arith.constant 2 : i32
    %78 = arith.addi %c0_i32_41, %c2_i32 : i32
    %c1_i32_42 = arith.constant 1 : i32
    scf.for %arg18 = %c0_i32_41 to %78 step %c1_i32_42  : i32 {
      %c0_53 = arith.constant 0 : index
      %c0_54 = arith.constant 0 : index
      %90 = vector.load %arg15[%c0_53, %c0_54] : memref<16x128xbf16, #tpu.memory_space<vmem>>, vector<16x128xbf16>
      %91 = arith.index_cast %arg18 : i32 to index
      %c0_55 = arith.constant 0 : index
      %c0_56 = arith.constant 0 : index
      %92 = vector.load %arg10[%91, %c0_55, %c0_56] : memref<2x128x256xbf16, #tpu.memory_space<vmem>>, vector<1x128x256xbf16>
      %93 = vector.shape_cast %92 : vector<1x128x256xbf16> to vector<128x256xbf16>
      %cst_57 = arith.constant dense<0.000000e+00> : vector<16x256xf32>
      %94 = tpu.matmul %90, %93, %cst_57 {dimension_numbers = #tpu.dot_dimension_numbers<[1], [0], [0], [1], [0, 0, 1, 1], [], []>} : vector<16x128xbf16>, vector<128x256xbf16>, vector<16x256xf32> -> vector<16x256xf32>
      %95 = arith.index_cast %arg18 : i32 to index
      %c0_58 = arith.constant 0 : index
      %c0_59 = arith.constant 0 : index
      %96 = vector.load %arg11[%95, %c0_58, %c0_59] : memref<2x1x256xf32, #tpu.memory_space<vmem>>, vector<1x1x256xf32>
      %97 = vector.shape_cast %96 : vector<1x1x256xf32> to vector<1x256xf32>
      %98 = vector.broadcast %97 : vector<1x256xf32> to vector<16x256xf32>
      %99 = arith.addf %94, %98 : vector<16x256xf32>
      %cst_60 = arith.constant 5.000000e-01 : f32
      %100 = vector.broadcast %cst_60 : f32 to vector<16x256xf32>
      %101 = arith.mulf %100, %99 : vector<16x256xf32>
      %cst_61 = arith.constant 2.000000e+00 : f32
      %102 = math.sqrt %cst_61 : f32
      %cst_62 = arith.constant 1.000000e+00 : f32
      %103 = arith.divf %cst_62, %102 : f32
      %104 = vector.broadcast %103 : f32 to vector<16x256xf32>
      %105 = arith.mulf %99, %104 : vector<16x256xf32>
      %106 = math.erf %105 : vector<16x256xf32>
      %cst_63 = arith.constant 1.000000e+00 : f32
      %107 = vector.broadcast %cst_63 : f32 to vector<16x256xf32>
      %108 = arith.addf %107, %106 : vector<16x256xf32>
      %109 = arith.mulf %101, %108 : vector<16x256xf32>
      %c0_64 = arith.constant 0 : index
      %c0_65 = arith.constant 0 : index
      %110 = vector.load %arg16[%c0_64, %c0_65] : memref<16x128xf32, #tpu.memory_space<vmem>>, vector<16x128xf32>
      %111 = arith.truncf %109 : vector<16x256xf32> to vector<16x256xbf16>
      %112 = arith.index_cast %arg18 : i32 to index
      %c0_66 = arith.constant 0 : index
      %c0_67 = arith.constant 0 : index
      %113 = vector.load %arg12[%112, %c0_66, %c0_67] : memref<2x256x128xbf16, #tpu.memory_space<vmem>>, vector<1x256x128xbf16>
      %114 = vector.shape_cast %113 : vector<1x256x128xbf16> to vector<256x128xbf16>
      %cst_68 = arith.constant dense<0.000000e+00> : vector<16x128xf32>
      %115 = tpu.matmul %111, %114, %cst_68 {dimension_numbers = #tpu.dot_dimension_numbers<[1], [0], [0], [1], [0, 0, 1, 1], [], []>} : vector<16x256xbf16>, vector<256x128xbf16>, vector<16x128xf32> -> vector<16x128xf32>
      %116 = arith.addf %110, %115 : vector<16x128xf32>
      %c0_69 = arith.constant 0 : index
      %c0_70 = arith.constant 0 : index
      %117 = vector.load %arg16[%c0_69, %c0_70] : memref<16x128xf32, #tpu.memory_space<vmem>>, vector<16x128xf32>
      tpu.vector_store %arg16[%c0_69, %c0_70], %116 {strides = array<i32>} : memref<16x128xf32, #tpu.memory_space<vmem>>, vector<16x128xf32>,
    }
    %c2_i32_43 = arith.constant 2 : i32
    %c0_44 = arith.constant 0 : index
    %c0_45 = arith.constant 0 : index
    %79 = vector.load %arg17[%c0_44, %c0_45] : memref<16x128xf32, #tpu.memory_space<vmem>>, vector<16x128xf32>
    %c0_46 = arith.constant 0 : index
    %c0_47 = arith.constant 0 : index
    %80 = vector.load %arg16[%c0_46, %c0_47] : memref<16x128xf32, #tpu.memory_space<vmem>>, vector<16x128xf32>
    %81 = arith.addf %79, %80 : vector<16x128xf32>
    %c0_48 = arith.constant 0 : index
    %c0_49 = arith.constant 0 : index
    %82 = vector.load %arg13[%c0_48, %c0_49] : memref<1x128xf32, #tpu.memory_space<vmem>>, vector<1x128xf32>
    %83 = vector.shape_cast %82 : vector<1x128xf32> to vector<128xf32>
    %84 = vector.shape_cast %83 : vector<128xf32> to vector<1x128xf32>
    %85 = vector.broadcast %84 : vector<1x128xf32> to vector<16x128xf32>
    %86 = arith.addf %81, %85 : vector<16x128xf32>
    %c0_50 = arith.constant 0 : index
    %c0_51 = arith.constant 0 : index
    %c0_52 = arith.constant 0 : index
    %87 = vector.load %arg14[%c0_50, %c0_51, %c0_52] : memref<1x16x128xf32, #tpu.memory_space<vmem>>, vector<1x16x128xf32>
    %88 = vector.shape_cast %87 : vector<1x16x128xf32> to vector<16x128xf32>
    %89 = vector.shape_cast %86 : vector<16x128xf32> to vector<1x16x128xf32>
    tpu.vector_store %arg14[%c0_50, %c0_51, %c0_52], %89 {strides = array<i32>} : memref<1x16x128xf32, #tpu.memory_space<vmem>>, vector<1x16x128xf32>,
    return
  }
  func.func @transform_0(%arg0: i32) -> (i32, i32, i32) {
    %c0_i32 = arith.constant 0 : i32
    %c0_i32_0 = arith.constant 0 : i32
    %c0_i32_1 = arith.constant 0 : i32
    return %arg0, %c0_i32, %c0_i32_0 : i32, i32, i32
  }
  func.func @transform_1(%arg0: i32) -> (i32, i32) {
    %c0_i32 = arith.constant 0 : i32
    %c0_i32_0 = arith.constant 0 : i32
    %c0_i32_1 = arith.constant 0 : i32
    return %c0_i32, %c0_i32_0 : i32, i32
  }
  func.func @transform_2(%arg0: i32) -> (i32, i32) {
    %c0_i32 = arith.constant 0 : i32
    %c0_i32_0 = arith.constant 0 : i32
    %c0_i32_1 = arith.constant 0 : i32
    return %c0_i32, %c0_i32_0 : i32, i32
  }
  func.func @transform_3(%arg0: i32) -> (i32, i32, i32) {
    %c0_i32 = arith.constant 0 : i32
    %c0_i32_0 = arith.constant 0 : i32
    %c0_i32_1 = arith.constant 0 : i32
    %c0_i32_2 = arith.constant 0 : i32
    return %c0_i32, %c0_i32_0, %c0_i32_1 : i32, i32, i32
  }
  func.func @transform_4(%arg0: i32) -> (i32, i32, i32) {
    %c0_i32 = arith.constant 0 : i32
    %c0_i32_0 = arith.constant 0 : i32
    %c0_i32_1 = arith.constant 0 : i32
    %c0_i32_2 = arith.constant 0 : i32
    return %c0_i32, %c0_i32_0, %c0_i32_1 : i32, i32, i32
  }
  func.func @transform_5(%arg0: i32) -> (i32, i32, i32) {
    %c0_i32 = arith.constant 0 : i32
    %c0_i32_0 = arith.constant 0 : i32
    %c0_i32_1 = arith.constant 0 : i32
    %c0_i32_2 = arith.constant 0 : i32
    return %c0_i32, %c0_i32_0, %c0_i32_1 : i32, i32, i32
  }
  func.func @transform_6(%arg0: i32) -> (i32, i32) {
    %c0_i32 = arith.constant 0 : i32
    %c0_i32_0 = arith.constant 0 : i32
    %c0_i32_1 = arith.constant 0 : i32
    return %c0_i32, %c0_i32_0 : i32, i32
  }
  func.func @transform_7(%arg0: i32) -> (i32, i32) {
    %c0_i32 = arith.constant 0 : i32
    %c0_i32_0 = arith.constant 0 : i32
    %c0_i32_1 = arith.constant 0 : i32
    return %c0_i32, %c0_i32_0 : i32, i32
  }
  func.func @transform_8(%arg0: i32) -> (i32, i32) {
    %c0_i32 = arith.constant 0 : i32
    %c0_i32_0 = arith.constant 0 : i32
    %c0_i32_1 = arith.constant 0 : i32
    return %c0_i32, %c0_i32_0 : i32, i32
  }
  func.func @transform_9(%arg0: i32) -> (i32, i32, i32) {
    %c0_i32 = arith.constant 0 : i32
    %c0_i32_0 = arith.constant 0 : i32
    %c0_i32_1 = arith.constant 0 : i32
    %c0_i32_2 = arith.constant 0 : i32
    return %c0_i32, %c0_i32_0, %c0_i32_1 : i32, i32, i32
  }
  func.func @transform_10(%arg0: i32) -> (i32, i32, i32) {
    %c0_i32 = arith.constant 0 : i32
    %c0_i32_0 = arith.constant 0 : i32
    %c0_i32_1 = arith.constant 0 : i32
    %c0_i32_2 = arith.constant 0 : i32
    return %c0_i32, %c0_i32_0, %c0_i32_1 : i32, i32, i32
  }
  func.func @transform_11(%arg0: i32) -> (i32, i32, i32) {
    %c0_i32 = arith.constant 0 : i32
    %c0_i32_0 = arith.constant 0 : i32
    %c0_i32_1 = arith.constant 0 : i32
    %c0_i32_2 = arith.constant 0 : i32
    return %c0_i32, %c0_i32_0, %c0_i32_1 : i32, i32, i32
  }
  func.func @transform_12(%arg0: i32) -> (i32, i32) {
    %c0_i32 = arith.constant 0 : i32
    %c0_i32_0 = arith.constant 0 : i32
    %c0_i32_1 = arith.constant 0 : i32
    return %c0_i32, %c0_i32_0 : i32, i32
  }
  func.func @transform_13(%arg0: i32) -> (i32, i32, i32) {
    %c0_i32 = arith.constant 0 : i32
    %c0_i32_0 = arith.constant 0 : i32
    %c0_i32_1 = arith.constant 0 : i32
    return %arg0, %c0_i32, %c0_i32_0 : i32, i32, i32
  }
}

module attributes {stable_mosaic.version = 11 : i64} {
  func.func @transformer_block_kernel(%arg0: i32, %arg1: memref<1x16x128xf32, #tpu.memory_space<vmem>>, %arg2: memref<1x128xf32, #tpu.memory_space<vmem>>, %arg3: memref<1x128xf32, #tpu.memory_space<vmem>>, %arg4: memref<4x128x96xbf16, #tpu.memory_space<vmem>>, %arg5: memref<4x1x96xf32, #tpu.memory_space<vmem>>, %arg6: memref<4x32x128xbf16, #tpu.memory_space<vmem>>, %arg7: memref<1x128xf32, #tpu.memory_space<vmem>>, %arg8: memref<1x128xf32, #tpu.memory_space<vmem>>, %arg9: memref<1x128xf32, #tpu.memory_space<vmem>>, %arg10: memref<2x128x256xbf16, #tpu.memory_space<vmem>>, %arg11: memref<2x1x256xf32, #tpu.memory_space<vmem>>, %arg12: memref<2x256x128xbf16, #tpu.memory_space<vmem>>, %arg13: memref<1x128xf32, #tpu.memory_space<vmem>>, %arg14: memref<1x16x128xf32, #tpu.memory_space<vmem>>, %arg15: memref<16x128xbf16, #tpu.memory_space<vmem>>, %arg16: memref<16x128xf32, #tpu.memory_space<vmem>>, %arg17: memref<16x128xf32, #tpu.memory_space<vmem>>) attributes {dimension_semantics = [#tpu.dimension_semantics<parallel>], iteration_bounds = array<i64: 2>, scalar_prefetch = 0 : i64, scratch_operands = 3 : i64, tpu.core_type = #tpu.core_type<tc>, window_params = [{transform_indices = @transform_0, window_bounds = array<i64: 1, 16, 128>}, {pipeline_mode = #tpu.pipeline_mode<synchronous>, transform_indices = @transform_1, window_bounds = array<i64: 1, 128>}, {pipeline_mode = #tpu.pipeline_mode<synchronous>, transform_indices = @transform_2, window_bounds = array<i64: 1, 128>}, {pipeline_mode = #tpu.pipeline_mode<synchronous>, transform_indices = @transform_3, window_bounds = array<i64: 4, 128, 96>}, {pipeline_mode = #tpu.pipeline_mode<synchronous>, transform_indices = @transform_4, window_bounds = array<i64: 4, 1, 96>}, {pipeline_mode = #tpu.pipeline_mode<synchronous>, transform_indices = @transform_5, window_bounds = array<i64: 4, 32, 128>}, {pipeline_mode = #tpu.pipeline_mode<synchronous>, transform_indices = @transform_6, window_bounds = array<i64: 1, 128>}, {pipeline_mode = #tpu.pipeline_mode<synchronous>, transform_indices = @transform_7, window_bounds = array<i64: 1, 128>}, {pipeline_mode = #tpu.pipeline_mode<synchronous>, transform_indices = @transform_8, window_bounds = array<i64: 1, 128>}, {pipeline_mode = #tpu.pipeline_mode<synchronous>, transform_indices = @transform_9, window_bounds = array<i64: 2, 128, 256>}, {pipeline_mode = #tpu.pipeline_mode<synchronous>, transform_indices = @transform_10, window_bounds = array<i64: 2, 1, 256>}, {pipeline_mode = #tpu.pipeline_mode<synchronous>, transform_indices = @transform_11, window_bounds = array<i64: 2, 256, 128>}, {pipeline_mode = #tpu.pipeline_mode<synchronous>, transform_indices = @transform_12, window_bounds = array<i64: 1, 128>}, {transform_indices = @transform_13, window_bounds = array<i64: 1, 16, 128>}]} {
    %c0 = arith.constant 0 : index
    %c0_0 = arith.constant 0 : index
    %c0_1 = arith.constant 0 : index
    %0 = vector.load %arg1[%c0, %c0_0, %c0_1] : memref<1x16x128xf32, #tpu.memory_space<vmem>>, vector<1x16x128xf32>
    %1 = vector.shape_cast %0 : vector<1x16x128xf32> to vector<16x128xf32>
    %c0_2 = arith.constant 0 : index
    %c0_3 = arith.constant 0 : index
    %2 = vector.load %arg2[%c0_2, %c0_3] : memref<1x128xf32, #tpu.memory_space<vmem>>, vector<1x128xf32>
    %3 = vector.shape_cast %2 : vector<1x128xf32> to vector<128xf32>
    %c0_4 = arith.constant 0 : index
    %c0_5 = arith.constant 0 : index
    %4 = vector.load %arg3[%c0_4, %c0_5] : memref<1x128xf32, #tpu.memory_space<vmem>>, vector<1x128xf32>
    %5 = vector.shape_cast %4 : vector<1x128xf32> to vector<128xf32>
    %cst = arith.constant dense<0.000000e+00> : vector<16xf32>
    %6 = vector.multi_reduction <add>, %1, %cst [1] : vector<16x128xf32> to vector<16xf32>
    %7 = vector.shape_cast %6 : vector<16xf32> to vector<16x1xf32>
    %cst_6 = arith.constant 1.280000e+02 : f32
    %8 = vector.broadcast %cst_6 : f32 to vector<16x1xf32>
    %9 = arith.divf %7, %8 : vector<16x1xf32>
    %10 = vector.broadcast %9 : vector<16x1xf32> to vector<16x128xf32>
    %11 = arith.subf %1, %10 : vector<16x128xf32>
    %12 = arith.mulf %11, %11 : vector<16x128xf32>
    %cst_7 = arith.constant dense<0.000000e+00> : vector<16xf32>
    %13 = vector.multi_reduction <add>, %12, %cst_7 [1] : vector<16x128xf32> to vector<16xf32>
    %14 = vector.shape_cast %13 : vector<16xf32> to vector<16x1xf32>
    %cst_8 = arith.constant 1.280000e+02 : f32
    %15 = vector.broadcast %cst_8 : f32 to vector<16x1xf32>
    %16 = arith.divf %14, %15 : vector<16x1xf32>
    %17 = vector.broadcast %9 : vector<16x1xf32> to vector<16x128xf32>
    %18 = arith.subf %1, %17 : vector<16x128xf32>
    %cst_9 = arith.constant 9.99999974E-6 : f32
    %19 = vector.broadcast %cst_9 : f32 to vector<16x1xf32>
    %20 = arith.addf %16, %19 : vector<16x1xf32>
    %21 = math.rsqrt %20 : vector<16x1xf32>
    %22 = vector.broadcast %21 : vector<16x1xf32> to vector<16x128xf32>
    %23 = arith.mulf %18, %22 : vector<16x128xf32>
    %24 = vector.shape_cast %3 : vector<128xf32> to vector<1x128xf32>
    %25 = vector.broadcast %24 : vector<1x128xf32> to vector<16x128xf32>
    %26 = arith.mulf %23, %25 : vector<16x128xf32>
    %27 = vector.shape_cast %5 : vector<128xf32> to vector<1x128xf32>
    %28 = vector.broadcast %27 : vector<1x128xf32> to vector<16x128xf32>
    %29 = arith.addf %26, %28 : vector<16x128xf32>
    %30 = arith.truncf %29 : vector<16x128xf32> to vector<16x128xbf16>
    %c0_10 = arith.constant 0 : index
    %c0_11 = arith.constant 0 : index
    %31 = vector.load %arg15[%c0_10, %c0_11] : memref<16x128xbf16, #tpu.memory_space<vmem>>, vector<16x128xbf16>
    tpu.vector_store %arg15[%c0_10, %c0_11], %30 {strides = array<i32>} : memref<16x128xbf16, #tpu.memory_space<vmem>>, vector<16x128xbf16>,
    %cst_12 = arith.constant 0.000000e+00 : f32
    %32 = vector.broadcast %cst_12 : f32 to vector<16x128xf32>
    %c0_13 = arith.constant 0 : index
    %c0_14 = arith.constant 0 : index
    %33 = vector.load %arg16[%c0_13, %c0_14] : memref<16x128xf32, #tpu.memory_space<vmem>>, vector<16x128xf32>
    tpu.vector_store %arg16[%c0_13, %c0_14], %32 {strides = array<i32>} : memref<16x128xf32, #tpu.memory_space<vmem>>, vector<16x128xf32>,
    %c0_i32 = arith.constant 0 : i32
    %c4_i32 = arith.constant 4 : i32
    %34 = arith.addi %c0_i32, %c4_i32 : i32
    %c1_i32 = arith.constant 1 : i32
    scf.for %arg18 = %c0_i32 to %34 step %c1_i32  : i32 {
      %c0_53 = arith.constant 0 : index
      %c0_54 = arith.constant 0 : index
      %90 = vector.load %arg15[%c0_53, %c0_54] : memref<16x128xbf16, #tpu.memory_space<vmem>>, vector<16x128xbf16>
      %91 = arith.index_cast %arg18 : i32 to index
      %c0_55 = arith.constant 0 : index
      %c0_56 = arith.constant 0 : index
      %92 = vector.load %arg4[%91, %c0_55, %c0_56] : memref<4x128x96xbf16, #tpu.memory_space<vmem>>, vector<1x128x96xbf16>
      %93 = vector.shape_cast %92 : vector<1x128x96xbf16> to vector<128x96xbf16>
      %cst_57 = arith.constant dense<0.000000e+00> : vector<16x96xf32>
      %94 = tpu.matmul %90, %93, %cst_57 {dimension_numbers = #tpu.dot_dimension_numbers<[1], [0], [0], [1], [0, 0, 1, 1], [], []>} : vector<16x128xbf16>, vector<128x96xbf16>, vector<16x96xf32> -> vector<16x96xf32>
      %95 = arith.index_cast %arg18 : i32 to index
      %c0_58 = arith.constant 0 : index
      %c0_59 = arith.constant 0 : index
      %96 = vector.load %arg5[%95, %c0_58, %c0_59] : memref<4x1x96xf32, #tpu.memory_space<vmem>>, vector<1x1x96xf32>
      %97 = vector.shape_cast %96 : vector<1x1x96xf32> to vector<1x96xf32>
      %98 = vector.broadcast %97 : vector<1x96xf32> to vector<16x96xf32>
      %99 = arith.addf %94, %98 : vector<16x96xf32>
      %100 = vector.extract_strided_slice %99 {offsets = [0, 0], sizes = [16, 32], strides = [1, 1]} : vector<16x96xf32> to vector<16x32xf32>
      %101 = arith.truncf %100 : vector<16x32xf32> to vector<16x32xbf16>
      %102 = vector.extract_strided_slice %99 {offsets = [0, 32], sizes = [16, 32], strides = [1, 1]} : vector<16x96xf32> to vector<16x32xf32>
      %103 = arith.truncf %102 : vector<16x32xf32> to vector<16x32xbf16>
      %104 = vector.extract_strided_slice %99 {offsets = [0, 64], sizes = [16, 32], strides = [1, 1]} : vector<16x96xf32> to vector<16x32xf32>
      %105 = arith.truncf %104 : vector<16x32xf32> to vector<16x32xbf16>
      %cst_60 = arith.constant dense<0.000000e+00> : vector<16x16xf32>
      %106 = tpu.matmul %101, %103, %cst_60 {dimension_numbers = #tpu.dot_dimension_numbers<[1], [1], [0], [0], [0, 0, 1, 0], [], []>} : vector<16x32xbf16>, vector<16x32xbf16>, vector<16x16xf32> -> vector<16x16xf32>
      %cst_61 = arith.constant dense<0xFF800000> : vector<16xf32>
      %107 = vector.multi_reduction <maximumf>, %106, %cst_61 [1] : vector<16x16xf32> to vector<16xf32>
      %108 = vector.shape_cast %107 : vector<16xf32> to vector<16x1xf32>
      %109 = vector.broadcast %108 : vector<16x1xf32> to vector<16x16xf32>
      %110 = arith.subf %106, %109 : vector<16x16xf32>
      %111 = math.exp %110 : vector<16x16xf32>
      %cst_62 = arith.constant dense<0.000000e+00> : vector<16xf32>
      %112 = vector.multi_reduction <add>, %111, %cst_62 [1] : vector<16x16xf32> to vector<16xf32>
      %113 = vector.shape_cast %112 : vector<16xf32> to vector<16x1xf32>
      %114 = tpu.reciprocal %113 : vector<16x1xf32> -> vector<16x1xf32>
      %115 = vector.broadcast %114 : vector<16x1xf32> to vector<16x16xf32>
      %116 = arith.mulf %111, %115 : vector<16x16xf32>
      %117 = arith.truncf %116 : vector<16x16xf32> to vector<16x16xbf16>
      %cst_63 = arith.constant dense<0.000000e+00> : vector<16x32xf32>
      %118 = tpu.matmul %117, %105, %cst_63 {dimension_numbers = #tpu.dot_dimension_numbers<[1], [0], [0], [1], [0, 0, 1, 1], [], []>} : vector<16x16xbf16>, vector<16x32xbf16>, vector<16x32xf32> -> vector<16x32xf32>
      %c0_64 = arith.constant 0 : index
      %c0_65 = arith.constant 0 : index
      %119 = vector.load %arg16[%c0_64, %c0_65] : memref<16x128xf32, #tpu.memory_space<vmem>>, vector<16x128xf32>
      %120 = arith.truncf %118 : vector<16x32xf32> to vector<16x32xbf16>
      %121 = arith.index_cast %arg18 : i32 to index
      %c0_66 = arith.constant 0 : index
      %c0_67 = arith.constant 0 : index
      %122 = vector.load %arg6[%121, %c0_66, %c0_67] : memref<4x32x128xbf16, #tpu.memory_space<vmem>>, vector<1x32x128xbf16>
      %123 = vector.shape_cast %122 : vector<1x32x128xbf16> to vector<32x128xbf16>
      %cst_68 = arith.constant dense<0.000000e+00> : vector<16x128xf32>
      %124 = tpu.matmul %120, %123, %cst_68 {dimension_numbers = #tpu.dot_dimension_numbers<[1], [0], [0], [1], [0, 0, 1, 1], [], []>} : vector<16x32xbf16>, vector<32x128xbf16>, vector<16x128xf32> -> vector<16x128xf32>
      %125 = arith.addf %119, %124 : vector<16x128xf32>
      %c0_69 = arith.constant 0 : index
      %c0_70 = arith.constant 0 : index
      %126 = vector.load %arg16[%c0_69, %c0_70] : memref<16x128xf32, #tpu.memory_space<vmem>>, vector<16x128xf32>
      tpu.vector_store %arg16[%c0_69, %c0_70], %125 {strides = array<i32>} : memref<16x128xf32, #tpu.memory_space<vmem>>, vector<16x128xf32>,
    }
    %c4_i32_15 = arith.constant 4 : i32
    %c0_16 = arith.constant 0 : index
    %c0_17 = arith.constant 0 : index
    %c0_18 = arith.constant 0 : index
    %35 = vector.load %arg1[%c0_16, %c0_17, %c0_18] : memref<1x16x128xf32, #tpu.memory_space<vmem>>, vector<1x16x128xf32>
    %36 = vector.shape_cast %35 : vector<1x16x128xf32> to vector<16x128xf32>
    %c0_19 = arith.constant 0 : index
    %c0_20 = arith.constant 0 : index
    %37 = vector.load %arg16[%c0_19, %c0_20] : memref<16x128xf32, #tpu.memory_space<vmem>>, vector<16x128xf32>
    %38 = arith.addf %36, %37 : vector<16x128xf32>
    %c0_21 = arith.constant 0 : index
    %c0_22 = arith.constant 0 : index
    %39 = vector.load %arg7[%c0_21, %c0_22] : memref<1x128xf32, #tpu.memory_space<vmem>>, vector<1x128xf32>
    %40 = vector.shape_cast %39 : vector<1x128xf32> to vector<128xf32>
    %41 = vector.shape_cast %40 : vector<128xf32> to vector<1x128xf32>
    %42 = vector.broadcast %41 : vector<1x128xf32> to vector<16x128xf32>
    %43 = arith.addf %38, %42 : vector<16x128xf32>
    %c0_23 = arith.constant 0 : index
    %c0_24 = arith.constant 0 : index
    %44 = vector.load %arg17[%c0_23, %c0_24] : memref<16x128xf32, #tpu.memory_space<vmem>>, vector<16x128xf32>
    tpu.vector_store %arg17[%c0_23, %c0_24], %43 {strides = array<i32>} : memref<16x128xf32, #tpu.memory_space<vmem>>, vector<16x128xf32>,
    %c0_25 = arith.constant 0 : index
    %c0_26 = arith.constant 0 : index
    %45 = vector.load %arg17[%c0_25, %c0_26] : memref<16x128xf32, #tpu.memory_space<vmem>>, vector<16x128xf32>
    %c0_27 = arith.constant 0 : index
    %c0_28 = arith.constant 0 : index
    %46 = vector.load %arg8[%c0_27, %c0_28] : memref<1x128xf32, #tpu.memory_space<vmem>>, vector<1x128xf32>
    %47 = vector.shape_cast %46 : vector<1x128xf32> to vector<128xf32>
    %c0_29 = arith.constant 0 : index
    %c0_30 = arith.constant 0 : index
    %48 = vector.load %arg9[%c0_29, %c0_30] : memref<1x128xf32, #tpu.memory_space<vmem>>, vector<1x128xf32>
    %49 = vector.shape_cast %48 : vector<1x128xf32> to vector<128xf32>
    %cst_31 = arith.constant dense<0.000000e+00> : vector<16xf32>
    %50 = vector.multi_reduction <add>, %45, %cst_31 [1] : vector<16x128xf32> to vector<16xf32>
    %51 = vector.shape_cast %50 : vector<16xf32> to vector<16x1xf32>
    %cst_32 = arith.constant 1.280000e+02 : f32
    %52 = vector.broadcast %cst_32 : f32 to vector<16x1xf32>
    %53 = arith.divf %51, %52 : vector<16x1xf32>
    %54 = vector.broadcast %53 : vector<16x1xf32> to vector<16x128xf32>
    %55 = arith.subf %45, %54 : vector<16x128xf32>
    %56 = arith.mulf %55, %55 : vector<16x128xf32>
    %cst_33 = arith.constant dense<0.000000e+00> : vector<16xf32>
    %57 = vector.multi_reduction <add>, %56, %cst_33 [1] : vector<16x128xf32> to vector<16xf32>
    %58 = vector.shape_cast %57 : vector<16xf32> to vector<16x1xf32>
    %cst_34 = arith.constant 1.280000e+02 : f32
    %59 = vector.broadcast %cst_34 : f32 to vector<16x1xf32>
    %60 = arith.divf %58, %59 : vector<16x1xf32>
    %61 = vector.broadcast %53 : vector<16x1xf32> to vector<16x128xf32>
    %62 = arith.subf %45, %61 : vector<16x128xf32>
    %cst_35 = arith.constant 9.99999974E-6 : f32
    %63 = vector.broadcast %cst_35 : f32 to vector<16x1xf32>
    %64 = arith.addf %60, %63 : vector<16x1xf32>
    %65 = math.rsqrt %64 : vector<16x1xf32>
    %66 = vector.broadcast %65 : vector<16x1xf32> to vector<16x128xf32>
    %67 = arith.mulf %62, %66 : vector<16x128xf32>
    %68 = vector.shape_cast %47 : vector<128xf32> to vector<1x128xf32>
    %69 = vector.broadcast %68 : vector<1x128xf32> to vector<16x128xf32>
    %70 = arith.mulf %67, %69 : vector<16x128xf32>
    %71 = vector.shape_cast %49 : vector<128xf32> to vector<1x128xf32>
    %72 = vector.broadcast %71 : vector<1x128xf32> to vector<16x128xf32>
    %73 = arith.addf %70, %72 : vector<16x128xf32>
    %74 = arith.truncf %73 : vector<16x128xf32> to vector<16x128xbf16>
    %c0_36 = arith.constant 0 : index
    %c0_37 = arith.constant 0 : index
    %75 = vector.load %arg15[%c0_36, %c0_37] : memref<16x128xbf16, #tpu.memory_space<vmem>>, vector<16x128xbf16>
    tpu.vector_store %arg15[%c0_36, %c0_37], %74 {strides = array<i32>} : memref<16x128xbf16, #tpu.memory_space<vmem>>, vector<16x128xbf16>,
    %cst_38 = arith.constant 0.000000e+00 : f32
    %76 = vector.broadcast %cst_38 : f32 to vector<16x128xf32>
    %c0_39 = arith.constant 0 : index
    %c0_40 = arith.constant 0 : index
    %77 = vector.load %arg16[%c0_39, %c0_40] : memref<16x128xf32, #tpu.memory_space<vmem>>, vector<16x128xf32>
    tpu.vector_store %arg16[%c0_39, %c0_40], %76 {strides = array<i32>} : memref<16x128xf32, #tpu.memory_space<vmem>>, vector<16x128xf32>,
    %c0_i32_41 = arith.constant 0 : i32
    %c2_i32 = arith.constant 2 : i32
    %78 = arith.addi %c0_i32_41, %c2_i32 : i32
    %c1_i32_42 = arith.constant 1 : i32
    scf.for %arg18 = %c0_i32_41 to %78 step %c1_i32_42  : i32 {
      %c0_53 = arith.constant 0 : index
      %c0_54 = arith.constant 0 : index
      %90 = vector.load %arg15[%c0_53, %c0_54] : memref<16x128xbf16, #tpu.memory_space<vmem>>, vector<16x128xbf16>
      %91 = arith.index_cast %arg18 : i32 to index
      %c0_55 = arith.constant 0 : index
      %c0_56 = arith.constant 0 : index
      %92 = vector.load %arg10[%91, %c0_55, %c0_56] : memref<2x128x256xbf16, #tpu.memory_space<vmem>>, vector<1x128x256xbf16>
      %93 = vector.shape_cast %92 : vector<1x128x256xbf16> to vector<128x256xbf16>
      %cst_57 = arith.constant dense<0.000000e+00> : vector<16x256xf32>
      %94 = tpu.matmul %90, %93, %cst_57 {dimension_numbers = #tpu.dot_dimension_numbers<[1], [0], [0], [1], [0, 0, 1, 1], [], []>} : vector<16x128xbf16>, vector<128x256xbf16>, vector<16x256xf32> -> vector<16x256xf32>
      %95 = arith.index_cast %arg18 : i32 to index
      %c0_58 = arith.constant 0 : index
      %c0_59 = arith.constant 0 : index
      %96 = vector.load %arg11[%95, %c0_58, %c0_59] : memref<2x1x256xf32, #tpu.memory_space<vmem>>, vector<1x1x256xf32>
      %97 = vector.shape_cast %96 : vector<1x1x256xf32> to vector<1x256xf32>
      %98 = vector.broadcast %97 : vector<1x256xf32> to vector<16x256xf32>
      %99 = arith.addf %94, %98 : vector<16x256xf32>
      %cst_60 = arith.constant 5.000000e-01 : f32
      %100 = vector.broadcast %cst_60 : f32 to vector<16x256xf32>
      %101 = arith.mulf %100, %99 : vector<16x256xf32>
      %cst_61 = arith.constant 2.000000e+00 : f32
      %102 = math.sqrt %cst_61 : f32
      %cst_62 = arith.constant 1.000000e+00 : f32
      %103 = arith.divf %cst_62, %102 : f32
      %104 = vector.broadcast %103 : f32 to vector<16x256xf32>
      %105 = arith.mulf %99, %104 : vector<16x256xf32>
      %106 = math.erf %105 : vector<16x256xf32>
      %cst_63 = arith.constant 1.000000e+00 : f32
      %107 = vector.broadcast %cst_63 : f32 to vector<16x256xf32>
      %108 = arith.addf %107, %106 : vector<16x256xf32>
      %109 = arith.mulf %101, %108 : vector<16x256xf32>
      %c0_64 = arith.constant 0 : index
      %c0_65 = arith.constant 0 : index
      %110 = vector.load %arg16[%c0_64, %c0_65] : memref<16x128xf32, #tpu.memory_space<vmem>>, vector<16x128xf32>
      %111 = arith.truncf %109 : vector<16x256xf32> to vector<16x256xbf16>
      %112 = arith.index_cast %arg18 : i32 to index
      %c0_66 = arith.constant 0 : index
      %c0_67 = arith.constant 0 : index
      %113 = vector.load %arg12[%112, %c0_66, %c0_67] : memref<2x256x128xbf16, #tpu.memory_space<vmem>>, vector<1x256x128xbf16>
      %114 = vector.shape_cast %113 : vector<1x256x128xbf16> to vector<256x128xbf16>
      %cst_68 = arith.constant dense<0.000000e+00> : vector<16x128xf32>
      %115 = tpu.matmul %111, %114, %cst_68 {dimension_numbers = #tpu.dot_dimension_numbers<[1], [0], [0], [1], [0, 0, 1, 1], [], []>} : vector<16x256xbf16>, vector<256x128xbf16>, vector<16x128xf32> -> vector<16x128xf32>
      %116 = arith.addf %110, %115 : vector<16x128xf32>
      %c0_69 = arith.constant 0 : index
      %c0_70 = arith.constant 0 : index
      %117 = vector.load %arg16[%c0_69, %c0_70] : memref<16x128xf32, #tpu.memory_space<vmem>>, vector<16x128xf32>
      tpu.vector_store %arg16[%c0_69, %c0_70], %116 {strides = array<i32>} : memref<16x128xf32, #tpu.memory_space<vmem>>, vector<16x128xf32>,
    }
    %c2_i32_43 = arith.constant 2 : i32
    %c0_44 = arith.constant 0 : index
    %c0_45 = arith.constant 0 : index
    %79 = vector.load %arg17[%c0_44, %c0_45] : memref<16x128xf32, #tpu.memory_space<vmem>>, vector<16x128xf32>
    %c0_46 = arith.constant 0 : index
    %c0_47 = arith.constant 0 : index
    %80 = vector.load %arg16[%c0_46, %c0_47] : memref<16x128xf32, #tpu.memory_space<vmem>>, vector<16x128xf32>
    %81 = arith.addf %79, %80 : vector<16x128xf32>
    %c0_48 = arith.constant 0 : index
    %c0_49 = arith.constant 0 : index
    %82 = vector.load %arg13[%c0_48, %c0_49] : memref<1x128xf32, #tpu.memory_space<vmem>>, vector<1x128xf32>
    %83 = vector.shape_cast %82 : vector<1x128xf32> to vector<128xf32>
    %84 = vector.shape_cast %83 : vector<128xf32> to vector<1x128xf32>
    %85 = vector.broadcast %84 : vector<1x128xf32> to vector<16x128xf32>
    %86 = arith.addf %81, %85 : vector<16x128xf32>
    %c0_50 = arith.constant 0 : index
    %c0_51 = arith.constant 0 : index
    %c0_52 = arith.constant 0 : index
    %87 = vector.load %arg14[%c0_50, %c0_51, %c0_52] : memref<1x16x128xf32, #tpu.memory_space<vmem>>, vector<1x16x128xf32>
    %88 = vector.shape_cast %87 : vector<1x16x128xf32> to vector<16x128xf32>
    %89 = vector.shape_cast %86 : vector<16x128xf32> to vector<1x16x128xf32>
    tpu.vector_store %arg14[%c0_50, %c0_51, %c0_52], %89 {strides = array<i32>} : memref<1x16x128xf32, #tpu.memory_space<vmem>>, vector<1x16x128xf32>,
    return
  }
  func.func @transform_0(%arg0: i32) -> (i32, i32, i32) {
    %c0_i32 = arith.constant 0 : i32
    %c0_i32_0 = arith.constant 0 : i32
    %c0_i32_1 = arith.constant 0 : i32
    return %arg0, %c0_i32, %c0_i32_0 : i32, i32, i32
  }
  func.func @transform_1(%arg0: i32) -> (i32, i32) {
    %c0_i32 = arith.constant 0 : i32
    %c0_i32_0 = arith.constant 0 : i32
    %c0_i32_1 = arith.constant 0 : i32
    return %c0_i32, %c0_i32_0 : i32, i32
  }
  func.func @transform_2(%arg0: i32) -> (i32, i32) {
    %c0_i32 = arith.constant 0 : i32
    %c0_i32_0 = arith.constant 0 : i32
    %c0_i32_1 = arith.constant 0 : i32
    return %c0_i32, %c0_i32_0 : i32, i32
  }
  func.func @transform_3(%arg0: i32) -> (i32, i32, i32) {
    %c0_i32 = arith.constant 0 : i32
    %c0_i32_0 = arith.constant 0 : i32
    %c0_i32_1 = arith.constant 0 : i32
    %c0_i32_2 = arith.constant 0 : i32
    return %c0_i32, %c0_i32_0, %c0_i32_1 : i32, i32, i32
  }
  func.func @transform_4(%arg0: i32) -> (i32, i32, i32) {
    %c0_i32 = arith.constant 0 : i32
    %c0_i32_0 = arith.constant 0 : i32
    %c0_i32_1 = arith.constant 0 : i32
    %c0_i32_2 = arith.constant 0 : i32
    return %c0_i32, %c0_i32_0, %c0_i32_1 : i32, i32, i32
  }
  func.func @transform_5(%arg0: i32) -> (i32, i32, i32) {
    %c0_i32 = arith.constant 0 : i32
    %c0_i32_0 = arith.constant 0 : i32
    %c0_i32_1 = arith.constant 0 : i32
    %c0_i32_2 = arith.constant 0 : i32
    return %c0_i32, %c0_i32_0, %c0_i32_1 : i32, i32, i32
  }
  func.func @transform_6(%arg0: i32) -> (i32, i32) {
    %c0_i32 = arith.constant 0 : i32
    %c0_i32_0 = arith.constant 0 : i32
    %c0_i32_1 = arith.constant 0 : i32
    return %c0_i32, %c0_i32_0 : i32, i32
  }
  func.func @transform_7(%arg0: i32) -> (i32, i32) {
    %c0_i32 = arith.constant 0 : i32
    %c0_i32_0 = arith.constant 0 : i32
    %c0_i32_1 = arith.constant 0 : i32
    return %c0_i32, %c0_i32_0 : i32, i32
  }
  func.func @transform_8(%arg0: i32) -> (i32, i32) {
    %c0_i32 = arith.constant 0 : i32
    %c0_i32_0 = arith.constant 0 : i32
    %c0_i32_1 = arith.constant 0 : i32
    return %c0_i32, %c0_i32_0 : i32, i32
  }
  func.func @transform_9(%arg0: i32) -> (i32, i32, i32) {
    %c0_i32 = arith.constant 0 : i32
    %c0_i32_0 = arith.constant 0 : i32
    %c0_i32_1 = arith.constant 0 : i32
    %c0_i32_2 = arith.constant 0 : i32
    return %c0_i32, %c0_i32_0, %c0_i32_1 : i32, i32, i32
  }
  func.func @transform_10(%arg0: i32) -> (i32, i32, i32) {
    %c0_i32 = arith.constant 0 : i32
    %c0_i32_0 = arith.constant 0 : i32
    %c0_i32_1 = arith.constant 0 : i32
    %c0_i32_2 = arith.constant 0 : i32
    return %c0_i32, %c0_i32_0, %c0_i32_1 : i32, i32, i32
  }
  func.func @transform_11(%arg0: i32) -> (i32, i32, i32) {
    %c0_i32 = arith.constant 0 : i32
    %c0_i32_0 = arith.constant 0 : i32
    %c0_i32_1 = arith.constant 0 : i32
    %c0_i32_2 = arith.constant 0 : i32
    return %c0_i32, %c0_i32_0, %c0_i32_1 : i32, i32, i32
  }
  func.func @transform_12(%arg0: i32) -> (i32, i32) {
    %c0_i32 = arith.constant 0 : i32
    %c0_i32_0 = arith.constant 0 : i32
    %c0_i32_1 = arith.constant 0 : i32
    return %c0_i32, %c0_i32_0 : i32, i32
  }
  func.func @transform_13(%arg0: i32) -> (i32, i32, i32) {
    %c0_i32 = arith.constant 0 : i32
    %c0_i32_0 = arith.constant 0 : i32
    %c0_i32_1 = arith.constant 0 : i32
    return %arg0, %c0_i32, %c0_i32_0 : i32, i32, i32
  }
}

</mosaic_0001>

<bundles_post_ra>
// kernel: tpu_custom_call.1
= control target key start
LH: loop header
LB: loop body
LE: loop exit
PB: predicated region body
PF: predicated region fallthrough
CT: control target
= control target key end

     0   :  { %18 = vsyncpa [#allocation6], 0  ;;  %s2146_s0 = inlined_call_operand.vmem [shape: f32[2,16,128], index: 0, kind: input, shape index: {}]   ;;  %s2147_s1 = inlined_call_operand.vmem [shape: f32[1,128], index: 1, kind: input, shape index: {}]   ;;  %s2148_s2 = inlined_call_operand.vmem [shape: f32[1,128], index: 2, kind: input, shape index: {}]   ;;  %s2149_s3 = inlined_call_operand.vmem [shape: bf16[4,128,96], index: 3, kind: input, shape index: {}]   ;;  %s2150_s4 = inlined_call_operand.vmem [shape: f32[4,1,96], index: 4, kind: input, shape index: {}]   ;;  %s2151_s5 = inlined_call_operand.vmem [shape: bf16[4,32,128], index: 5, kind: input, shape index: {}]   ;;  %s2152_s6 = inlined_call_operand.vmem [shape: f32[1,128], index: 6, kind: input, shape index: {}]   ;;  %s2153_s7 = inlined_call_operand.vmem [shape: f32[1,128], index: 7, kind: input, shape index: {}]   ;;  %s2154_s8 = inlined_call_operand.vmem [shape: f32[1,128], index: 8, kind: input, shape index: {}]   ;;  %s2155_s9 = inlined_call_operand.vmem [shape: bf16[2,128,256], index: 9, kind: input, shape index: {}]   ;;  %s2156_s10 = inlined_call_operand.vmem [shape: f32[2,1,256], index: 10, kind: input, shape index: {}]   ;;  %s2157_s11 = inlined_call_operand.hbm [shape: bf16[2,256,128], index: 11, kind: input, shape index: {}]   ;;  %s2158_s12 = inlined_call_operand.vmem [shape: f32[1,128], index: 12, kind: input, shape index: {}]   ;;  %s2159_s13 = inlined_call_operand.hbm [shape: f32[2,16,128], index: 13, kind: output, shape index: {}]  }
   0x1   :  { %19 = vsyncpa [#allocation7], 0 }
   0x2   :  { %21 = vsyncpa [#allocation7 + $0x1], 0  ;;  %s1871_s25 = smov 0   ;;  %s1873_s26 = smov 0  }
   0x3   :  { %s1875_s27 = smov 0   ;;  %s1877_s28 = smov 0  }
   0x4 LB: > { %2166 = sst [smem:[#allocation11_spill]] %s1775_s27  ;;  %s1892_s29 = sadd.s32 4294967295, %s1779_s28   ;;  %s1779_s28 = sphi %s1877_s28, %s2178_s28   ;;  %s1775_s27 = sphi %s1875_s27, %s2183_s27   ;;  %s1771_s26 = sphi %s1873_s26, %s2182_s26   ;;  %s1767_s25 = sphi %s1871_s25, %s2181_s25  }
   0x5   : > { %s1369_s30 = sadd.s32 4294967294, %s1779_s28   ;;  %s1896_s14 = sadd.s32 1, %s1779_s28  }
   0x6   : > { %2167 = sst [smem:[#allocation12_spill]] %s1896_s14  ;;  %s312_s15 = sadd.s32 1, %s1775_s27 }
   0x7   : > { %s309_s16 = ssub.s32 %s1779_s28, %s1896_s14  ;;  %p322_p0 = scmp.ne.s32.totalorder %s1775_s27, %s1771_s26 }
   0x8   : > { %p310_p1 = scmp.eq.s32.totalorder %s309_s16, 0  ;;  %p323_p2 = scmp.eq.s32.totalorder %s1892_s29, 1 }
   0x9   : > { %p328_p3 = scmp.ne.s32.totalorder %s1771_s26, %s1767_s25  ;;  %p329_p4 = scmp.eq.s32.totalorder %s1369_s30, 1 }
   0xa   : > { %s1907_s17 = scalar_select %p310_p1, %s1775_s27, %s312_s15  }
   0xb   : > { %p1909_p5 = por %p323_p2, %p322_p0  ;;  %p1913_p6 = por %p329_p4, %p328_p3 }
   0xc   : > { %2168 = sst [smem:[#allocation13_spill]] %s1907_s17  ;;  %p1370_p7 = scmp.ge.s32.totalorder %s1779_s28, 1 }
   0xd   : > { %s2169_s18 = scalar_select %p1909_p5, 1, 0 }
   0xe   : > { %s2170_s19 = scalar_select %p1913_p6, 1, 0 }
   0xf   : > { %p336_p8 = scmp.lt.s32.totalorder %s1779_s28, 3  ;;  %p2163_p9 = scmp.eq.s32.totalorder %s1892_s29, 0 }
  0x10   : > { %s1789_s21 = smov [#allocation5]   ;;  %s1677_s15 = scalar_lea.hbm %s2157_s11, 4096 }
  0x11   : > { %p1920_p10 = pnand %p1370_p7, %p336_p8  ;;  %s378_s22 = sshll.u32 %s1789_s21, 4  ;;  %s379_s22 = int_to_ptr.vmem [resolvable:$true] %s378_s22 }
  0x12   : > { %p1678_p13 = scmp.ne.s32.totalorder %s2157_s11, %s1677_s15  ;;  %p1684_p3 = scmp.lt.u32.totalorder %s1677_s15, %s2157_s11 }
  0x13   : > { %s2171_s20 = scalar_select %p1920_p10, 1, 0 }
  0x14   : > { %p1533_p11 = pneg %p1920_p10 }
  0x16   : > { %p1928_p12 = pnand %p2163_p9, %p1533_p11 }
  0x18   : > { %p1679_p0 = pneg %p1928_p12 }
  0x1a   : > { %p1680_p1 = pnand %p1679_p0, %p1678_p13 }
  0x1c   : > { %p1681_p2 = pneg %p1680_p1 }
  0x1e   : > { %p1686_p4 = pnand %p1684_p3, %p1681_p2 }
  0x20   : > { %1689 = shalt.err (!%p1686_p4)
}
  0x21   : > { %s1690_s14 = scalar_lea.vmem %s379_s22, 4096  ;;  %p1698_p9 = scmp.lt.s32.totalorder %s379_s22, %s379_s22 }
  0x22   : > { %p1691_p7 = scmp.ne.s32.totalorder %s379_s22, %s1690_s14  ;;  %p1699_p6 = scmp.lt.s32.totalorder %s1690_s14, %s1690_s14 }
  0x24   : > { %p1693_p8 = pnand %p1691_p7, %p1679_p0  ;;  %p1700_p5 = por %p1699_p6, %p1698_p9 }
  0x26   : > { %p1694_p11 = pneg %p1693_p8 }
  0x28   : > { %p1701_p10 = pnand %p1700_p5, %p1694_p11 }
  0x2a   : > { %1704 = shalt.err (!%p1701_p10)
}
  0x2b   : > { %s1790_s17 = smov 64   ;;  %s1791_s24 = smov 4  }
  0x2c   : > { %1536 = dma.hbm_to_vmem [thread:$0]  (!%p1928_p12), %s2157_s11, 4096, %s379_s22, [#allocation6], %s1790_s17, %s1790_s17, %s1791_s24  }
  0x2d   : > { %p2173_p13 = scmp.ne.s32.totalorder %s2171_s20, 0 }
  0x2e   : > { %p2174_p1 = scmp.eq.s32.totalorder (!%p2173_p13), %s1892_s29, 0 }
  0x2f   : > { %405 = sbr.rel (%p2173_p13) target bundleno = 2565 (0xa05), region = 72 }
  0x36   : > { %1758 = dma.done.wait (%p2174_p1), [#allocation6], 4096   ;;  %p2175_p0 = pmov %p2174_p1 }
  0x37   : > { %p449_p5 = scmp.lt.s32.totalorder %s1892_s29, 1  ;;  %v1792_v0 = vmov 0.0   ;;  %s446_s15 = sand.u32 1, %s1771_s26   ;;  %v1378_v19 = vld [vmem:[%s2147_s1] ss:$0 sm:$0xff] }
  0x38   : > { %1760 = vsyncadd (%p2175_p0), [#allocation6], 4294963200  ;;  %500 = vst [vmem:[#allocation3] sm:$0xff] %v1792_v0  ;;  %s1375_s21 = sshll.u32 %s446_s15, 4  ;;  %v1379_v23 = vld [vmem:[%s2148_s2] ss:$0 sm:$0xff] }
  0x39   : > { %501 = vst [vmem:[#allocation3 + $0x8] sm:$0xff] %v1792_v0  ;;  %s450_s27 = scalar_select %p449_p5, %s1892_s29, 1 }
  0x3b   : > { %s1443_s14 = sshll.u32 %s450_s27, 4  ;;  %s1974_s27 = scalar_lea.vmem [#allocation8], %s1375_s21 }
  0x3c   : > { %s1961_s20 = scalar_lea.vmem %s2146_s0, %s1443_s14  ;;  %s1976_s14 = smov 0  }
  0x3d   : > { %v455_v1 = vld [vmem:[%s1961_s20] sm:$0xff]  ;;  %v456_v2 = vld [vmem:[%s1961_s20 + $0x8] sm:$0xff] }
  0x3e   : > { %459 = vadd.xlane.f32.xlu0 %v455_v1 }
  0x42   : > { %461 = vadd.xlane.f32.xlu0 %v456_v2 }
  0xcb   : > { %v460_v3 = vpop.xlane.xlu0 %459 }
  0xcc   : > { %v464_v4 = vmul.f32 0.0078125, %v460_v3 }
  0xce   : > { %v466_v5 = vsub.f32 %v455_v1, %v464_v4 }
  0xcf   : > { %v462_v6 = vpop.xlane.xlu0 %461 }
  0xd0   : > { %v465_v7 = vmul.f32 0.0078125, %v462_v6  ;;  %v468_v8 = vmul.f32 %v466_v5, %v466_v5 }
  0xd2   : > { %v467_v9 = vsub.f32 %v456_v2, %v465_v7  ;;  %470 = vadd.xlane.f32.xlu1 %v468_v8 }
  0xd4   : > { %v469_v10 = vmul.f32 %v467_v9, %v467_v9 }
  0xd6   : > { %472 = vadd.xlane.f32.xlu1 %v469_v10 }
 0x15f   : > { %v471_v11 = vpop.xlane.xlu1 %470 }
 0x160   : > { %v474_v12 = vmul.f32 0.0078125, %v471_v11 }
 0x162   : > { %v476_v13 = vadd.f32 1e-05, %v474_v12 }
 0x163   : > { %v473_v14 = vpop.xlane.xlu1 %472 }
 0x164   : > { %1603 = vrsqrt.f32 %v476_v13  ;;  %v475_v15 = vmul.f32 0.0078125, %v473_v14 }
 0x166   : > { %v477_v16 = vadd.f32 1e-05, %v475_v15 }
 0x168   : > { %1605 = vrsqrt.f32 %v477_v16 }
 0x16e   : > { %v1604_v17 = vpop.eup %1603 }
 0x16f   : > { %v480_v18 = vmul.f32 %v1604_v17, %v466_v5 }
 0x171   : > { %v488_v21 = vmul.f32 %v1378_v19, %v480_v18 }
 0x172   : > { %v1606_v20 = vpop.eup %1605 }
 0x173   : > { %v481_v22 = vmul.f32 %v1606_v20, %v467_v9  ;;  %v496_v25 = vadd.f32 %v1379_v23, %v488_v21 }
 0x175   : > { %v489_v24 = vmul.f32 %v1378_v19, %v481_v22 }
 0x177   : > { %v497_v26 = vadd.f32 %v1379_v23, %v489_v24 }
 0x179   : > { %v498_v27 = vpack.c.bf16 %v497_v26, %v496_v25 }
 0x17b   : > { %499 = vst [vmem:[#allocation2] sm:$0xff] %v498_v27 }
 0x17c LB: >> { %v1793_v28 = vmov 0.0   ;;  %vm1794_vm0 = vmmov 0   ;;  %s1444_s22 = sshll.u32 %s1783_s14, 6  ;;  %s528_s16 = scalar_lea.vmem %s2150_s4, %s1783_s14  ;;  %vm629_vm1 = vcmask 261120   ;;  %vm677_vm2 = vcmask 130048   ;;  %v748_v16 = vld [vmem:[#allocation3] sm:$0xff]  ;;  %s1783_s14 = sphi %s1976_s14, %s507_s14  }
 0x17d   : >> { %1487 = vmatprep.subr.bf16.mxu0 %v1793_v28  ;;  %1503 = vmatprep.mubr.msk.bf16.mxu0 %vm1794_vm0, %v1793_v28  ;;  %s511_s17 = scalar_lea.vmem %s2149_s3, %s1444_s22  ;;  %v1382_v38 = vld [vmem:[%s528_s16] ss:$0 sm:$0xff]  ;;  %s1795_s22 = smov 96   ;;  %v749_v18 = vld [vmem:[#allocation3 + $0x8] sm:$0xff] }
 0x17e   : >> { %1507 = vmatprep.subr.bf16.mxu1 %v1793_v28  ;;  %1509 = vmatprep.mubr.msk.bf16.mxu1 %vm1794_vm0, %v1793_v28  ;;  %v1607_v29 = vld [vmem:[%s511_s17] sm:$0xff]   ;;  %v1608_v30 = vld [vmem:[%s511_s17 + $0x8] sm:$0xff]   ;;  %v1609_v31 = vld [vmem:[%s511_s17 + $0x10] sm:$0xff]   ;;  %s1796_s23 = smov 64   ;;  %s1445_s21 = sshll.u32 %s1783_s14, 4 }
 0x17f   : >> { %1488 = vmatpush3.bf16.msra.mxu0 %v1607_v29  ;;  %v1610_v32 = vld [vmem:[%s511_s17 + $0x18] sm:$0xff]   ;;  %v1611_v33 = vld [vmem:[%s511_s17 + $0x20] sm:$0xff]   ;;  %v1612_v34 = vld [vmem:[%s511_s17 + $0x28] sm:$0xff]   ;;  %s753_s30 = scalar_lea.vmem %s2151_s5, %s1445_s21  ;;  %s507_s14 = sadd.s32 1, %s1783_s14  }
 0x180   : >> { %1489 = vmatprep.subr.bf16.mxu0 %v1793_v28  ;;  %v1613_v35 = vld [vmem:[%s511_s17 + $0x30] sm:$0xff]   ;;  %v1614_v36 = vld [vmem:[%s511_s17 + $0x38] sm:$0xff]   ;;  %v1615_v8 = vld [vmem:[%s753_s30] sm:$0xff]   ;;  %p504_p6 = scmp.ge.s32.totalorder %s507_s14, 4  }
 0x181   : >> { %v1616_v10 = vld [vmem:[%s753_s30 + $0x8] sm:$0xff]   ;;  %v818_v24 = vld [vmem:[%s1961_s20] sm:$0xff] (%p504_p6)  ;;  %s2037_s17 = smov (%p504_p6), 0  }
 0x182   : >> { %v508_v37 = vld [vmem:[#allocation2] sm:$0xff] }
 0x183   : >> { %1490 = vmatpush3.bf16.msra.mxu0 %v1608_v30  ;;  %v1398_v26 = vld [vmem:[%s2152_s6] ss:$0 sm:$0xff] (%p504_p6) }
 0x184   : >> { %1491 = vmatprep.subr.bf16.mxu0 %v1793_v28 }
 0x187   : >> { %1492 = vmatpush3.bf16.msra.mxu0 %v1609_v31 }
 0x188   : >> { %1493 = vmatprep.subr.bf16.mxu0 %v1793_v28 }
 0x18b   : >> { %1494 = vmatpush3.bf16.msra.mxu0 %v1610_v32 }
 0x18c   : >> { %1495 = vmatprep.subr.bf16.mxu0 %v1793_v28 }
 0x18f   : >> { %1496 = vmatpush3.bf16.msra.mxu0 %v1611_v33 }
 0x190   : >> { %1497 = vmatprep.subr.bf16.mxu0 %v1793_v28 }
 0x193   : >> { %1498 = vmatpush3.bf16.msra.mxu0 %v1612_v34 }
 0x194   : >> { %1499 = vmatprep.subr.bf16.mxu0 %v1793_v28 }
 0x197   : >> { %1500 = vmatpush3.bf16.msra.mxu0 %v1613_v35 }
 0x198   : >> { %1501 = vmatprep.subr.bf16.mxu0 %v1793_v28 }
 0x19b   : >> { %1502 = vmatpush3.bf16.msra.mxu0 %v1614_v36 }
 0x19e   : >> { %1504 = vmatmul.mubr.bf16.vlgmr.msra.gmra.mrb[0].mxu0 %v508_v37 }
 0x271   : >> { %v618_v39 = vpop.f32.mrb[0].mxu0 }
 0x272   : >> { %v1505_v40 = vpop.f32.mrb[1].mxu0  ;;  %v619_v42 = vadd.f32 %v1382_v38, %v618_v39 }
 0x273   : >> { %v621_v41 = vpop.f32.mrb[2].mxu0 }
 0x274   : >> { %v622_v43 = vadd.f32 %v1382_v38, %v621_v41  ;;  %v1506_v44 = vpop.f32.mrb[3].mxu0 }
 0x276   : >> { %v625_v45 = vpack.c.bf16 %v622_v43, %v619_v42 }
 0x278   : >> { %627 = vrot.lane.b32.xlu0 %v625_v45, %s1795_s22 }
 0x2ea   : >> { %v628_v46 = vpop.permute.xlu0 %627 }
 0x2eb   : >> { %v634_v47 = vsel %vm629_vm1, %v628_v46, 0 }
 0x2ec   : >> { %1508 = vmatpush3.bf16.xpose.msra.mxu1 %v634_v47 }
 0x2ed   : >> { %1513 = vmatprep.subr.bf16.mxu1 %v1793_v28 }
 0x2f3   : >> { %1510 = vmatmul.mubr.msk.bf16.vlgmr.msra.gmra.mrb[0].mxu1 %vm629_vm1, %v625_v45 }
 0x2f4   : >> { %1515 = vmatprep.mubr.msk.bf16.mxu1 %vm1794_vm0, %v1793_v28 }
 0x3c6   : >> { %v670_v48 = vpop.f32.mrb[0].mxu1 }
 0x3c7   : >> { %v1511_v49 = vpop.f32.mrb[1].mxu1  ;;  %v678_v50 = vsel %vm677_vm2, %v670_v48, -inf }
 0x3c8   : >> { %679 = vmax.xlane.f32.xlu0 %v678_v50  ;;  %v673_v51 = vpop.f32.mrb[2].mxu1 }
 0x3c9   : >> { %v1512_v52 = vpop.f32.mrb[3].mxu1  ;;  %v681_v53 = vsel %vm677_vm2, %v673_v51, -inf }
 0x3ca   : >> { %682 = vmax.xlane.f32.xlu1 %v681_v53  ;;  %v1400_v52 = vld [vmem:[%s2154_s8] ss:$0 sm:$0xff] (%p504_p6) }
 0x455   : >> { %v680_v54 = vpop.xlane.xlu0 %679 }
 0x456   : >> { %v684_v55 = vsub.f32 %v670_v48, %v680_v54  ;;  %v1399_v48 = vld [vmem:[%s2153_s7] ss:$0 sm:$0xff] (%p504_p6) }
 0x457   : >> { %v683_v56 = vpop.xlane.xlu1 %682 }
 0x458   : >> { %v686_v57 = vmul.f32 1.442695, %v684_v55  ;;  %v685_v58 = vsub.f32 %v673_v51, %v683_v56 }
 0x45a   : >> { %1617 = vpow2.f32 %v686_v57  ;;  %v688_v59 = vmul.f32 1.442695, %v685_v58 }
 0x45c   : >> { %1619 = vpow2.f32 %v688_v59 }
 0x464   : >> { %v1618_v60 = vpop.eup %1617 }
 0x465   : >> { %v690_v61 = vsel %vm677_vm2, %v1618_v60, 0.0 }
 0x466   : >> { %v1620_v62 = vpop.eup %1619  ;;  %691 = vadd.xlane.f32.xlu1 %v690_v61 }
 0x467   : >> { %v693_v63 = vsel %vm677_vm2, %v1620_v62, 0.0 }
 0x46a   : >> { %694 = vadd.xlane.f32.xlu1 %v693_v63 }
 0x47b   : >> { %701 = vrot.lane.b32.xlu1 %v625_v45, %s1796_s23 }
 0x4f3   : >> { %v692_v1 = vpop.xlane.xlu1 %691 }
 0x4f4   : >> { %1621 = vrcp.f32 %v692_v1 }
 0x4f7   : >> { %v695_v2 = vpop.xlane.xlu1 %694 }
 0x4f8   : >> { %1623 = vrcp.f32 %v695_v2 }
 0x4fb   : >> { %v702_v3 = vpop.permute.xlu1 %701 }
 0x4fc   : >> { %1514 = vmatpush3.bf16.msra.mxu1 %v702_v3 }
 0x4fd   : >> { %1519 = vmatprep.subr.bf16.mxu1 %v1793_v28 }
 0x4fe   : >> { %v1622_v4 = vpop.eup %1621 }
 0x4ff   : >> { %v698_v6 = vmul.f32 %v1622_v4, %v1618_v60 }
 0x502   : >> { %v1624_v5 = vpop.eup %1623 }
 0x503   : >> { %v699_v7 = vmul.f32 %v1624_v5, %v1620_v62 }
 0x505   : >> { %v700_v9 = vpack.c.bf16 %v699_v7, %v698_v6 }
 0x507   : >> { %1516 = vmatmul.mubr.msk.bf16.vlgmr.msra.gmra.mrb[4].mxu1 %vm677_vm2, %v700_v9 }
 0x508   : >> { %1520 = vmatpush3.bf16.msra.mxu1 %v1615_v8  ;;  %1523 = vmatprep.mubr.msk.bf16.mxu1 %vm1794_vm0, %v1793_v28 }
 0x509   : >> { %1521 = vmatprep.subr.bf16.mxu1 %v1793_v28  ;;  %v819_v28 = vld [vmem:[%s1961_s20 + $0x8] sm:$0xff] (%p504_p6) }
 0x50c   : >> { %1522 = vmatpush3.bf16.msra.mxu1 %v1616_v10 }
 0x5da   : >> { %v741_v11 = vpop.f32.mrb[4].mxu1 }
 0x5db   : >> { %v1517_v12 = vpop.f32.mrb[5].mxu1 }
 0x5dc   : >> { %v744_v13 = vpop.f32.mrb[6].mxu1 }
 0x5dd   : >> { %v750_v14 = vpack.c.bf16 %v744_v13, %v741_v11  ;;  %v1518_v15 = vpop.f32.mrb[7].mxu1 }
 0x5df   : >> { %1524 = vmatmul.mubr.msk.bf16.vlgmr.msra.gmra.mrb[8].mxu1 %vm629_vm1, %v750_v14 }
 0x6b1   : > { %506 = sbr.rel (!%p504_p6) target bundleno = 380 (0x17c), region = 132 }
 0x6b2   : >> { %v807_v17 = vpop.f32.mrb[8].mxu1 }
 0x6b3   : >> { %v814_v19 = vadd.f32 %v807_v17, %v748_v16  ;;  %v1525_v20 = vpop.f32.mrb[9].mxu1 }
 0x6b4   : >> { %v810_v21 = vpop.f32.mrb[10].mxu1 }
 0x6b5   : >> { %816 = vst [vmem:[#allocation3] sm:$0xff] %v814_v19  ;;  %v815_v22 = vadd.f32 %v810_v21, %v749_v18  ;;  %v1526_v23 = vpop.f32.mrb[11].mxu1 }
 0x6b7   : >> { %817 = vst [vmem:[#allocation3 + $0x8] sm:$0xff] %v815_v22 }
 0x6bc   : > { %v820_v25 = vld [vmem:[#allocation3] sm:$0xff] }
 0x6bd   : > { %v822_v27 = vadd.f32 %v820_v25, %v818_v24  ;;  %879 = vst [vmem:[#allocation3] sm:$0xff] %v1792_v0 }
 0x6be   : > { %v821_v29 = vld [vmem:[#allocation3 + $0x8] sm:$0xff] }
 0x6bf   : > { %v823_v30 = vadd.f32 %v821_v29, %v819_v28  ;;  %880 = vst [vmem:[#allocation3 + $0x8] sm:$0xff] %v1792_v0  ;;  %v831_v31 = vadd.f32 %v1398_v26, %v822_v27 }
 0x6c1   : > { %v832_v32 = vadd.f32 %v1398_v26, %v823_v30  ;;  %833 = vst [vmem:[#allocation4] sm:$0xff] %v831_v31  ;;  %839 = vadd.xlane.f32.xlu0 %v831_v31 }
 0x6c3   : > { %834 = vst [vmem:[#allocation4 + $0x8] sm:$0xff] %v832_v32 }
 0x6c5   : > { %841 = vadd.xlane.f32.xlu0 %v832_v32 }
 0x74e   : > { %v840_v33 = vpop.xlane.xlu0 %839 }
 0x74f   : > { %v843_v34 = vmul.f32 0.0078125, %v840_v33 }
 0x751   : > { %v845_v35 = vsub.f32 %v831_v31, %v843_v34 }
 0x752   : > { %v842_v36 = vpop.xlane.xlu0 %841 }
 0x753   : > { %v844_v37 = vmul.f32 0.0078125, %v842_v36  ;;  %v847_v38 = vmul.f32 %v845_v35, %v845_v35 }
 0x755   : > { %v846_v39 = vsub.f32 %v832_v32, %v844_v37  ;;  %849 = vadd.xlane.f32.xlu1 %v847_v38 }
 0x757   : > { %v848_v40 = vmul.f32 %v846_v39, %v846_v39 }
 0x759   : > { %851 = vadd.xlane.f32.xlu1 %v848_v40 }
 0x7e2   : > { %v850_v41 = vpop.xlane.xlu1 %849 }
 0x7e3   : > { %v853_v42 = vmul.f32 0.0078125, %v850_v41 }
 0x7e5   : > { %v855_v43 = vadd.f32 1e-05, %v853_v42 }
 0x7e6   : > { %v852_v0 = vpop.xlane.xlu1 %851 }
 0x7e7   : > { %1625 = vrsqrt.f32 %v855_v43  ;;  %v854_v44 = vmul.f32 0.0078125, %v852_v0 }
 0x7e9   : > { %v856_v45 = vadd.f32 1e-05, %v854_v44 }
 0x7eb   : > { %1627 = vrsqrt.f32 %v856_v45 }
 0x7f1   : > { %v1626_v46 = vpop.eup %1625 }
 0x7f2   : > { %v859_v47 = vmul.f32 %v1626_v46, %v845_v35 }
 0x7f4   : > { %v867_v50 = vmul.f32 %v1399_v48, %v859_v47 }
 0x7f5   : > { %v1628_v49 = vpop.eup %1627 }
 0x7f6   : > { %v860_v51 = vmul.f32 %v1628_v49, %v846_v39  ;;  %v875_v54 = vadd.f32 %v1400_v52, %v867_v50 }
 0x7f8   : > { %v868_v53 = vmul.f32 %v1399_v48, %v860_v51 }
 0x7fa   : > { %v876_v55 = vadd.f32 %v1400_v52, %v868_v53 }
 0x7fc   : > { %v877_v56 = vpack.c.bf16 %v876_v55, %v875_v54 }
 0x7fe   : > { %878 = vst [vmem:[#allocation2] sm:$0xff] %v877_v56 }
 0x7ff LB: >> { %v1797_v57 = vmov 0   ;;  %s1446_s24 = sshll.u32 %s1787_s17, 7  ;;  %v911_v28 = vlaneseq  ;;  %s1403_s14 = sshll.u32 %s1787_s17, 1  ;;  %s1787_s17 = sphi %s2037_s17, %s886_s17  }
 0x800   : >> { %1033 = vmatprep.mubr.bf16.mxu0 %v1797_v57  ;;  %s2046_s22 = scalar_lea.vmem %s2155_s9, %s1446_s24  ;;  %s2057_s20 = scalar_lea.vmem [#allocation5], %s1446_s24 }
 0x801   : >> { %v1629_v58 = vld [vmem:[%s2046_s22 + $0x4] ss:$8 sps:$4 sm:$0xff]   ;;  %v1631_v59 = vld [vmem:[%s2046_s22] ss:$8 sps:$4 sm:$0xff]   ;;  %v1632_v60 = vld [vmem:[%s2046_s22 + $0x14] ss:$8 sps:$4 sm:$0xff]   ;;  %s908_s24 = scalar_lea.vmem %s2156_s10, %s1403_s14 }
 0x802   : >> { %1001 = vmatprep.subr.bf16.mxu0 %v1629_v58  ;;  %v1634_v61 = vld [vmem:[%s2046_s22 + $0x10] ss:$8 sps:$4 sm:$0xff]   ;;  %v1635_v62 = vld [vmem:[%s2046_s22 + $0x24] ss:$8 sps:$4 sm:$0xff]   ;;  %v1637_v63 = vld [vmem:[%s2046_s22 + $0x20] ss:$8 sps:$4 sm:$0xff]  }
 0x803   : >> { %1002 = vmatpush1.bf16.msra.mxu0 %v1631_v59  ;;  %v1638_v1 = vld [vmem:[%s2046_s22 + $0x34] ss:$8 sps:$4 sm:$0xff]   ;;  %v1640_v2 = vld [vmem:[%s2046_s22 + $0x30] ss:$8 sps:$4 sm:$0xff]   ;;  %v1641_v3 = vld [vmem:[%s2046_s22 + $0x44] ss:$8 sps:$4 sm:$0xff]  }
 0x804   : >> { %1003 = vmatprep.subr.bf16.mxu0 %v1632_v60  ;;  %v1653_v4 = vld [vmem:[%s2057_s20 + $0x40] sm:$0xff]   ;;  %v1655_v7 = vld [vmem:[%s2057_s20 + $0x48] sm:$0xff]   ;;  %v1644_v8 = vld [vmem:[%s2046_s22 + $0x54] ss:$8 sps:$4 sm:$0xff]   ;;  %v912_v29 = vshrl.u32 %v911_v28, 7  ;;  %s886_s17 = sadd.s32 1, %s1787_s17  }
 0x805   : >> { %v1654_v5 = vld [vmem:[%s2057_s20] sm:$0xff]   ;;  %1465 = vmatprep.subr.bf16.mxu1 %v1653_v4  ;;  %v1656_v9 = vld [vmem:[%s2057_s20 + $0x8] sm:$0xff]   ;;  %v1646_v10 = vld [vmem:[%s2046_s22 + $0x50] ss:$8 sps:$4 sm:$0xff]   ;;  %p883_p9 = scmp.ge.s32.totalorder %s886_s17, 2  }
 0x806   : >> { %v1643_v6 = vld [vmem:[%s2046_s22 + $0x40] ss:$8 sps:$4 sm:$0xff]   ;;  %1466 = vmatpush3.bf16.msra.mxu1 %v1654_v5  ;;  %v1647_v11 = vld [vmem:[%s2046_s22 + $0x64] ss:$8 sps:$4 sm:$0xff]   ;;  %v1650_v13 = vld [vmem:[%s2046_s22 + $0x74] ss:$8 sps:$4 sm:$0xff]  }
 0x807   : >> { %1004 = vmatpush1.bf16.msra.mxu0 %v1634_v61  ;;  %1467 = vmatprep.subr.bf16.mxu1 %v1655_v7  ;;  %v1649_v12 = vld [vmem:[%s2046_s22 + $0x60] ss:$8 sps:$4 sm:$0xff]   ;;  %v1652_v14 = vld [vmem:[%s2046_s22 + $0x70] ss:$8 sps:$4 sm:$0xff]   ;;  %v913_v30 = vsub.s32 0, %v912_v29  ;;  %v917_v32 = vsub.s32 1, %v912_v29 }
 0x808   : >> { %1005 = vmatprep.subr.bf16.mxu0 %v1635_v62  ;;  %v887_v15 = vld [vmem:[#allocation2] sm:$0xff]  ;;  %v1657_v16 = vld [vmem:[%s2057_s20 + $0x50] sm:$0xff]   ;;  %v1659_v18 = vld [vmem:[%s2057_s20 + $0x58] sm:$0xff]   ;;  %s1448_s22 = sshll.u32 (%p883_p9), %s1892_s29, 8  ;;  %s2105_s29 = scalar_lea.sflag (%p883_p9), [#allocation7], %s446_s15 }
 0x809   : >> { %v1658_v17 = vld [vmem:[%s2057_s20 + $0x10] sm:$0xff]   ;;  %v1660_v19 = vld [vmem:[%s2057_s20 + $0x18] sm:$0xff]   ;;  %v1661_v20 = vld [vmem:[%s2057_s20 + $0x60] sm:$0xff]   ;;  %s2097_s23 = scalar_lea.hbm (%p883_p9), %s2159_s13, %s1448_s22  ;;  %p2176_p12 = scmp.ne.s32.totalorder (%p883_p9), %s2169_s18, 0 }
 0x80a   : >> { %1468 = vmatpush3.bf16.msra.mxu1 %v1656_v9  ;;  %v1662_v21 = vld [vmem:[%s2057_s20 + $0x20] sm:$0xff]   ;;  %v1663_v22 = vld [vmem:[%s2057_s20 + $0x68] sm:$0xff]   ;;  %v1665_v24 = vld [vmem:[%s2057_s20 + $0x70] sm:$0xff]  }
 0x80b   : >> { %1006 = vmatpush1.bf16.msra.mxu0 %v1637_v63  ;;  %1469 = vmatprep.subr.bf16.mxu1 %v1657_v16  ;;  %v1664_v23 = vld [vmem:[%s2057_s20 + $0x28] sm:$0xff]   ;;  %v1666_v25 = vld [vmem:[%s2057_s20 + $0x30] sm:$0xff]   ;;  %v1667_v26 = vld [vmem:[%s2057_s20 + $0x78] sm:$0xff]  }
 0x80c   : >> { %1007 = vmatprep.subr.bf16.mxu0 %v1638_v1  ;;  %v1668_v27 = vld [vmem:[%s2057_s20 + $0x38] sm:$0xff]   ;;  %v909_v31 = vld [vmem:[%s908_s24] sm:$0x3]  ;;  %s1274_s20 = sshll.u32 (%p883_p9), %s1974_s27, 4  ;;  %s1798_s24 = smov (%p883_p9), [#allocation8]   ;;  %s2099_s20 = int_to_ptr.vmem [resolvable:$true] %s1274_s20 }
 0x80d   : >> { %v914_v33 = vrot.slane %v909_v31, %v913_v30  ;;  %v918_v34 = vrot.slane %v909_v31, %v917_v32  ;;  %s1705_s21 = scalar_lea.vmem (%p883_p9), %s2099_s20, 256  ;;  %s1709_s30 = sshll.u32 (%p883_p9), %s1798_s24, 4  ;;  %s1710_s30 = int_to_ptr.vmem [resolvable:$false] %s1709_s30 }
 0x80e   : >> { %1470 = vmatpush3.bf16.msra.mxu1 %v1658_v17  ;;  %p1706_p10 = scmp.ne.s32.totalorder (%p883_p9), %s2099_s20, %s1705_s21  ;;  %s1711_s16 = scalar_lea.vmem (%p883_p9), %s1710_s30, 512 }
 0x80f   : >> { %1008 = vmatpush1.bf16.msra.mxu0 %v1640_v2  ;;  %1471 = vmatprep.subr.bf16.mxu1 %v1659_v18  ;;  %v1064_v2 = vld [vmem:[#allocation3] sm:$0xff]  ;;  %p1712_p4 = scmp.lt.s32.totalorder (%p883_p9), %s2099_s20, %s1710_s30  ;;  %p1713_p7 = scmp.lt.s32.totalorder (%p883_p9), %s1711_s16, %s1705_s21 }
 0x810   : >> { %1009 = vmatprep.subr.bf16.mxu0 %v1641_v3  ;;  %p1707_p2 = pnand (%p883_p9), %p1706_p10, %p2176_p12 }
 0x811   : > { %p1714_p8 = por (%p883_p9), %p1713_p7, %p1712_p4 }
 0x812   : >> { %1472 = vmatpush3.bf16.msra.mxu1 %v1660_v19  ;;  %p1708_p3 = pneg (%p883_p9), %p1707_p2 }
 0x813   : >> { %1010 = vmatpush1.bf16.msra.mxu0 %v1643_v6  ;;  %1473 = vmatprep.subr.bf16.mxu1 %v1661_v20  ;;  %v1065_v6 = vld [vmem:[#allocation3 + $0x8] sm:$0xff] }
 0x814   : >> { %1011 = vmatprep.subr.bf16.mxu0 %v1644_v8  ;;  %p1715_p11 = pnand (%p883_p9), %p1714_p8, %p1708_p3 }
 0x816   : >> { %1474 = vmatpush3.bf16.msra.mxu1 %v1662_v21 }
 0x817   : >> { %1012 = vmatpush1.bf16.msra.mxu0 %v1646_v10  ;;  %1475 = vmatprep.subr.bf16.mxu1 %v1663_v22 }
 0x818   : >> { %1013 = vmatprep.subr.bf16.mxu0 %v1647_v11  ;;  %v1243_v11 = vld [vmem:[#allocation4] sm:$0xff] (%p883_p9) }
 0x81a   : >> { %1476 = vmatpush3.bf16.msra.mxu1 %v1664_v23 }
 0x81b   : >> { %1014 = vmatpush1.bf16.msra.mxu0 %v1649_v12  ;;  %1477 = vmatprep.subr.bf16.mxu1 %v1665_v24 }
 0x81c   : >> { %1015 = vmatprep.subr.bf16.mxu0 %v1650_v13  ;;  %v1437_v13 = vld [vmem:[%s2158_s12] ss:$0 sm:$0xff] (%p883_p9) }
 0x81e   : >> { %1478 = vmatpush3.bf16.msra.mxu1 %v1666_v25 }
 0x81f   : >> { %1016 = vmatpush1.bf16.msra.mxu0 %v1652_v14  ;;  %1479 = vmatprep.subr.bf16.mxu1 %v1667_v26 }
 0x822   : >> { %1034 = vmatmul.mubr.bf16.vlgmr.msra.gmra.mrb[0].mxu0 %v887_v15  ;;  %1480 = vmatpush3.bf16.msra.mxu1 %v1668_v27  ;;  %v1244_v15 = vld [vmem:[#allocation4 + $0x8] sm:$0xff] (%p883_p9) }
 0x8f5   : >> { %v1035_v35 = vpop.f32.mrb[0].mxu0 }
 0x8f6   : >> { %v1036_v36 = vadd.f32 %v1035_v35, %v914_v33  ;;  %v1037_v37 = vpop.f32.mrb[1].mxu0 }
 0x8f7   : >> { %v1038_v38 = vadd.f32 %v1037_v37, %v918_v34  ;;  %v1039_v39 = vpop.f32.mrb[2].mxu0 }
 0x8f8   : >> { %v1048_v40 = vmul.f32 0.70710677, %v1036_v36  ;;  %v1040_v41 = vadd.f32 %v1039_v39, %v914_v33  ;;  %v1041_v42 = vpop.f32.mrb[3].mxu0  ;;  %v1044_v52 = vmul.f32 0.5, %v1036_v36 }
 0x8f9   : >> { %v1049_v43 = vmul.f32 0.70710677, %v1038_v38  ;;  %v1042_v0 = vadd.f32 %v1041_v42, %v918_v34  ;;  %v1045_v55 = vmul.f32 0.5, %v1038_v38 }
 0x8fa   : >> { %1669 = verf.f32 %v1048_v40  ;;  %v1050_v44 = vmul.f32 0.70710677, %v1040_v41  ;;  %v1046_v53 = vmul.f32 0.5, %v1040_v41 }
 0x8fb   : >> { %1671 = verf.f32 %v1049_v43  ;;  %v1051_v45 = vmul.f32 0.70710677, %v1042_v0  ;;  %v1047_v56 = vmul.f32 0.5, %v1042_v0 }
 0x8fc   : >> { %1673 = verf.f32 %v1050_v44 }
 0x8fd   : >> { %1675 = verf.f32 %v1051_v45 }
 0x904   : >> { %v1670_v46 = vpop.eup %1669 }
 0x905   : >> { %v1672_v47 = vpop.eup %1671  ;;  %v1056_v48 = vadd.f32 1.0, %v1670_v46 }
 0x906   : >> { %v1674_v49 = vpop.eup %1673  ;;  %v1057_v50 = vadd.f32 1.0, %v1672_v47 }
 0x907   : >> { %v1676_v51 = vpop.eup %1675  ;;  %v1058_v54 = vadd.f32 1.0, %v1674_v49  ;;  %v1060_v58 = vmul.f32 %v1056_v48, %v1044_v52 }
 0x908   : >> { %v1059_v57 = vadd.f32 1.0, %v1676_v51  ;;  %v1061_v60 = vmul.f32 %v1057_v50, %v1045_v55 }
 0x909   : >> { %v1062_v59 = vmul.f32 %v1058_v54, %v1046_v53 }
 0x90a   : >> { %v1063_v61 = vmul.f32 %v1059_v57, %v1047_v56 }
 0x90b   : >> { %v1066_v62 = vpack.c.bf16 %v1062_v59, %v1060_v58 }
 0x90c   : >> { %v1067_v63 = vpack.c.bf16 %v1063_v61, %v1061_v60 }
 0x90e   : >> { %1230 = vmatprep.mubr.bf16.mxu1 %v1067_v63 }
 0x90f   : >> { %1231 = vmatmul.mubr.bf16.vlgmr.msra.gmra.mrb[0].mxu1 %v1066_v62 }
 0x9e2   : >> { %v1481_v1 = vpop.f32.mrb[0].mxu1 }
 0x9e3   : >> { %v1482_v3 = vpop.f32.mrb[1].mxu1 }
 0x9e4   : >> { %v1483_v4 = vadd.f32 %v1482_v3, %v1481_v1  ;;  %v1484_v5 = vpop.f32.mrb[2].mxu1  ;;  %885 = sbr.rel (!%p883_p9) target bundleno = 2047 (0x7ff), region = 143 }
 0x9e5   : >> { %v1485_v7 = vpop.f32.mrb[3].mxu1 }
 0x9e6   : >> { %v1239_v8 = vadd.f32 %v1483_v4, %v1064_v2  ;;  %v1486_v9 = vadd.f32 %v1485_v7, %v1484_v5 }
 0x9e8   : >> { %1241 = vst [vmem:[#allocation3] sm:$0xff] %v1239_v8  ;;  %v1240_v10 = vadd.f32 %v1486_v9, %v1065_v6 }
 0x9ea   : >> { %1242 = vst [vmem:[#allocation3 + $0x8] sm:$0xff] %v1240_v10 }
 0x9ef   : > { %v1245_v12 = vld [vmem:[#allocation3] sm:$0xff] }
 0x9f0   : > { %v1247_v14 = vadd.f32 %v1245_v12, %v1243_v11 }
 0x9f1   : > { %v1246_v16 = vld [vmem:[#allocation3 + $0x8] sm:$0xff] }
 0x9f2   : > { %v1248_v17 = vadd.f32 %v1246_v16, %v1244_v15  ;;  %v1256_v18 = vadd.f32 %v1437_v13, %v1247_v14 }
 0x9f4   : > { %v1257_v19 = vadd.f32 %v1437_v13, %v1248_v17  ;;  %1258 = vst [vmem:[%s1974_s27] sm:$0xff] %v1256_v18 }
 0x9f6   : > { %1259 = vst [vmem:[%s1974_s27 + $0x8] sm:$0xff] %v1257_v19 }
 0x9f7   : > { %1718 = shalt.err (!%p1715_p11)
}
 0x9f8   : > { %s1719_s15 = scalar_lea.hbm %s2097_s23, 256  ;;  %s1723_s17 = scalar_lea.hbm %s2159_s13, 512 }
 0x9f9   : > { %p1720_p13 = scmp.ne.s32.totalorder %s2097_s23, %s1719_s15  ;;  %p1724_p5 = scmp.lt.u32.totalorder %s2097_s23, %s2159_s13 }
 0x9fa   : > { %p1725_p6 = scmp.lt.u32.totalorder %s1723_s17, %s1719_s15  ;;  %p1727_p10 = scmp.lt.u32.totalorder %s1719_s15, %s2097_s23 }
 0x9fb   : > { %p1721_p1 = pnand %p1720_p13, %p2176_p12 }
 0x9fc   : > { %p1726_p9 = por %p1725_p6, %p1724_p5 }
 0x9fd   : > { %p1722_p0 = pneg %p1721_p1 }
 0x9fe   : > { %p1728_p2 = por %p1727_p10, %p1726_p9 }
 0xa00   : > { %p1729_p3 = pnand %p1728_p2, %p1722_p0 }
 0xa02   : > { %1732 = shalt.err (!%p1729_p3)
}
 0xa03   : > { %s1799_s21 = smov 128   ;;  %s1800_s30 = smov 8  }
 0xa04   : > { %1531 = dma.vmem_to_hbm [thread:$0]  (%p2176_p12), %s2099_s20, 256, %s2097_s23, %s2105_s29, %s1799_s21, %s1799_s21, %s1800_s30  }
 0xa05 PF: > { %p1543_p4 = scmp.ge.s32.totalorder %s1779_s28, 2  ;;  %s1289_s16 = sand.u32 1, %s1767_s25  }
 0xa06   : > { %p2177_p7 = scmp.ne.s32.totalorder %s2170_s19, 0  ;;  %s1290_s15 = scalar_lea.sflag [#allocation7], %s1289_s16 }
 0xa08   : > { %p1538_p8 = pnand %p1543_p4, %p2177_p7 }
 0xa0a   : > { %1762 = dma.done.wait (!%p1538_p8), %s1290_s15, 256  }
 0xa0b   : > { %1764 = vsyncadd (!%p1538_p8), %s1290_s15, 4294967040  ;;  %s2178_s28 = sld [smem:[#allocation12_spill]]  ;;  %s2179_s27 = sld [smem:[#allocation11_spill]] }
 0xa0c   : > { %s2180_s22 = sld [smem:[#allocation13_spill]]  ;;  %s2181_s25 = smov %s1771_s26 }
 0xa11   : > { %p24_p11 = scmp.ge.s32.totalorder %s2178_s28, 4   ;;  %s2182_s26 = smov %s2179_s27 }
 0xa12   : > { %s2183_s27 = smov %s2180_s22 }
 0xa13   :  { %26 = sbr.rel (!%p24_p11) target bundleno = 4 (0x4), region = 154 }
 0xa1a   :  { %1295 = vsyncpa [#allocation6], 1 }
 0xa1b   :  { %1297 = vsyncpa [#allocation6 + $0x1], 1 }
 0xa1c   :  { %1298 = vsyncpa [#allocation7], 1 }
 0xa1d   :  { %1300 = vsyncpa [#allocation7 + $0x1], 1 }

// kernel: tpu_custom_call.1
= control target key start
LH: loop header
LB: loop body
LE: loop exit
PB: predicated region body
PF: predicated region fallthrough
CT: control target
= control target key end

     0   :  { %18 = vsyncpa [#allocation6], 0  ;;  %s2146_s0 = inlined_call_operand.vmem [shape: f32[2,16,128], index: 0, kind: input, shape index: {}]   ;;  %s2147_s1 = inlined_call_operand.vmem [shape: f32[1,128], index: 1, kind: input, shape index: {}]   ;;  %s2148_s2 = inlined_call_operand.vmem [shape: f32[1,128], index: 2, kind: input, shape index: {}]   ;;  %s2149_s3 = inlined_call_operand.vmem [shape: bf16[4,128,96], index: 3, kind: input, shape index: {}]   ;;  %s2150_s4 = inlined_call_operand.vmem [shape: f32[4,1,96], index: 4, kind: input, shape index: {}]   ;;  %s2151_s5 = inlined_call_operand.vmem [shape: bf16[4,32,128], index: 5, kind: input, shape index: {}]   ;;  %s2152_s6 = inlined_call_operand.vmem [shape: f32[1,128], index: 6, kind: input, shape index: {}]   ;;  %s2153_s7 = inlined_call_operand.vmem [shape: f32[1,128], index: 7, kind: input, shape index: {}]   ;;  %s2154_s8 = inlined_call_operand.vmem [shape: f32[1,128], index: 8, kind: input, shape index: {}]   ;;  %s2155_s9 = inlined_call_operand.vmem [shape: bf16[2,128,256], index: 9, kind: input, shape index: {}]   ;;  %s2156_s10 = inlined_call_operand.vmem [shape: f32[2,1,256], index: 10, kind: input, shape index: {}]   ;;  %s2157_s11 = inlined_call_operand.hbm [shape: bf16[2,256,128], index: 11, kind: input, shape index: {}]   ;;  %s2158_s12 = inlined_call_operand.vmem [shape: f32[1,128], index: 12, kind: input, shape index: {}]   ;;  %s2159_s13 = inlined_call_operand.hbm [shape: f32[2,16,128], index: 13, kind: output, shape index: {}]  }
   0x1   :  { %19 = vsyncpa [#allocation7], 0 }
   0x2   :  { %21 = vsyncpa [#allocation7 + $0x1], 0  ;;  %s1871_s25 = smov 0   ;;  %s1873_s26 = smov 0  }
   0x3   :  { %s1875_s27 = smov 0   ;;  %s1877_s28 = smov 0  }
   0x4 LB: > { %2166 = sst [smem:[#allocation11_spill]] %s1775_s27  ;;  %s1892_s29 = sadd.s32 4294967295, %s1779_s28   ;;  %s1779_s28 = sphi %s1877_s28, %s2178_s28   ;;  %s1775_s27 = sphi %s1875_s27, %s2183_s27   ;;  %s1771_s26 = sphi %s1873_s26, %s2182_s26   ;;  %s1767_s25 = sphi %s1871_s25, %s2181_s25  }
   0x5   : > { %s1369_s30 = sadd.s32 4294967294, %s1779_s28   ;;  %s1896_s14 = sadd.s32 1, %s1779_s28  }
   0x6   : > { %2167 = sst [smem:[#allocation12_spill]] %s1896_s14  ;;  %s312_s15 = sadd.s32 1, %s1775_s27 }
   0x7   : > { %s309_s16 = ssub.s32 %s1779_s28, %s1896_s14  ;;  %p322_p0 = scmp.ne.s32.totalorder %s1775_s27, %s1771_s26 }
   0x8   : > { %p310_p1 = scmp.eq.s32.totalorder %s309_s16, 0  ;;  %p323_p2 = scmp.eq.s32.totalorder %s1892_s29, 1 }
   0x9   : > { %p328_p3 = scmp.ne.s32.totalorder %s1771_s26, %s1767_s25  ;;  %p329_p4 = scmp.eq.s32.totalorder %s1369_s30, 1 }
   0xa   : > { %s1907_s17 = scalar_select %p310_p1, %s1775_s27, %s312_s15  }
   0xb   : > { %p1909_p5 = por %p323_p2, %p322_p0  ;;  %p1913_p6 = por %p329_p4, %p328_p3 }
   0xc   : > { %2168 = sst [smem:[#allocation13_spill]] %s1907_s17  ;;  %p1370_p7 = scmp.ge.s32.totalorder %s1779_s28, 1 }
   0xd   : > { %s2169_s18 = scalar_select %p1909_p5, 1, 0 }
   0xe   : > { %s2170_s19 = scalar_select %p1913_p6, 1, 0 }
   0xf   : > { %p336_p8 = scmp.lt.s32.totalorder %s1779_s28, 3  ;;  %p2163_p9 = scmp.eq.s32.totalorder %s1892_s29, 0 }
  0x10   : > { %s1789_s21 = smov [#allocation5]   ;;  %s1677_s15 = scalar_lea.hbm %s2157_s11, 4096 }
  0x11   : > { %p1920_p10 = pnand %p1370_p7, %p336_p8  ;;  %s378_s22 = sshll.u32 %s1789_s21, 4  ;;  %s379_s22 = int_to_ptr.vmem [resolvable:$true] %s378_s22 }
  0x12   : > { %p1678_p13 = scmp.ne.s32.totalorder %s2157_s11, %s1677_s15  ;;  %p1684_p3 = scmp.lt.u32.totalorder %s1677_s15, %s2157_s11 }
  0x13   : > { %s2171_s20 = scalar_select %p1920_p10, 1, 0 }
  0x14   : > { %p1533_p11 = pneg %p1920_p10 }
  0x16   : > { %p1928_p12 = pnand %p2163_p9, %p1533_p11 }
  0x18   : > { %p1679_p0 = pneg %p1928_p12 }
  0x1a   : > { %p1680_p1 = pnand %p1679_p0, %p1678_p13 }
  0x1c   : > { %p1681_p2 = pneg %p1680_p1 }
  0x1e   : > { %p1686_p4 = pnand %p1684_p3, %p1681_p2 }
  0x20   : > { %1689 = shalt.err (!%p1686_p4)
}
  0x21   : > { %s1690_s14 = scalar_lea.vmem %s379_s22, 4096  ;;  %p1698_p9 = scmp.lt.s32.totalorder %s379_s22, %s379_s22 }
  0x22   : > { %p1691_p7 = scmp.ne.s32.totalorder %s379_s22, %s1690_s14  ;;  %p1699_p6 = scmp.lt.s32.totalorder %s1690_s14, %s1690_s14 }
  0x24   : > { %p1693_p8 = pnand %p1691_p7, %p1679_p0  ;;  %p1700_p5 = por %p1699_p6, %p1698_p9 }
  0x26   : > { %p1694_p11 = pneg %p1693_p8 }
  0x28   : > { %p1701_p10 = pnand %p1700_p5, %p1694_p11 }
  0x2a   : > { %1704 = shalt.err (!%p1701_p10)
}
  0x2b   : > { %s1790_s17 = smov 64   ;;  %s1791_s24 = smov 4  }
  0x2c   : > { %1536 = dma.hbm_to_vmem [thread:$0]  (!%p1928_p12), %s2157_s11, 4096, %s379_s22, [#allocation6], %s1790_s17, %s1790_s17, %s1791_s24  }
  0x2d   : > { %p2173_p13 = scmp.ne.s32.totalorder %s2171_s20, 0 }
  0x2e   : > { %p2174_p1 = scmp.eq.s32.totalorder (!%p2173_p13), %s1892_s29, 0 }
  0x2f   : > { %405 = sbr.rel (%p2173_p13) target bundleno = 2565 (0xa05), region = 72 }
  0x36   : > { %1758 = dma.done.wait (%p2174_p1), [#allocation6], 4096   ;;  %p2175_p0 = pmov %p2174_p1 }
  0x37   : > { %p449_p5 = scmp.lt.s32.totalorder %s1892_s29, 1  ;;  %v1792_v0 = vmov 0.0   ;;  %s446_s15 = sand.u32 1, %s1771_s26   ;;  %v1378_v19 = vld [vmem:[%s2147_s1] ss:$0 sm:$0xff] }
  0x38   : > { %1760 = vsyncadd (%p2175_p0), [#allocation6], 4294963200  ;;  %500 = vst [vmem:[#allocation3] sm:$0xff] %v1792_v0  ;;  %s1375_s21 = sshll.u32 %s446_s15, 4  ;;  %v1379_v23 = vld [vmem:[%s2148_s2] ss:$0 sm:$0xff] }
  0x39   : > { %501 = vst [vmem:[#allocation3 + $0x8] sm:$0xff] %v1792_v0  ;;  %s450_s27 = scalar_select %p449_p5, %s1892_s29, 1 }
  0x3b   : > { %s1443_s14 = sshll.u32 %s450_s27, 4  ;;  %s1974_s27 = scalar_lea.vmem [#allocation8], %s1375_s21 }
  0x3c   : > { %s1961_s20 = scalar_lea.vmem %s2146_s0, %s1443_s14  ;;  %s1976_s14 = smov 0  }
  0x3d   : > { %v455_v1 = vld [vmem:[%s1961_s20] sm:$0xff]  ;;  %v456_v2 = vld [vmem:[%s1961_s20 + $0x8] sm:$0xff] }
  0x3e   : > { %459 = vadd.xlane.f32.xlu0 %v455_v1 }
  0x42   : > { %461 = vadd.xlane.f32.xlu0 %v456_v2 }
  0xcb   : > { %v460_v3 = vpop.xlane.xlu0 %459 }
  0xcc   : > { %v464_v4 = vmul.f32 0.0078125, %v460_v3 }
  0xce   : > { %v466_v5 = vsub.f32 %v455_v1, %v464_v4 }
  0xcf   : > { %v462_v6 = vpop.xlane.xlu0 %461 }
  0xd0   : > { %v465_v7 = vmul.f32 0.0078125, %v462_v6  ;;  %v468_v8 = vmul.f32 %v466_v5, %v466_v5 }
  0xd2   : > { %v467_v9 = vsub.f32 %v456_v2, %v465_v7  ;;  %470 = vadd.xlane.f32.xlu1 %v468_v8 }
  0xd4   : > { %v469_v10 = vmul.f32 %v467_v9, %v467_v9 }
  0xd6   : > { %472 = vadd.xlane.f32.xlu1 %v469_v10 }
 0x15f   : > { %v471_v11 = vpop.xlane.xlu1 %470 }
 0x160   : > { %v474_v12 = vmul.f32 0.0078125, %v471_v11 }
 0x162   : > { %v476_v13 = vadd.f32 1e-05, %v474_v12 }
 0x163   : > { %v473_v14 = vpop.xlane.xlu1 %472 }
 0x164   : > { %1603 = vrsqrt.f32 %v476_v13  ;;  %v475_v15 = vmul.f32 0.0078125, %v473_v14 }
 0x166   : > { %v477_v16 = vadd.f32 1e-05, %v475_v15 }
 0x168   : > { %1605 = vrsqrt.f32 %v477_v16 }
 0x16e   : > { %v1604_v17 = vpop.eup %1603 }
 0x16f   : > { %v480_v18 = vmul.f32 %v1604_v17, %v466_v5 }
 0x171   : > { %v488_v21 = vmul.f32 %v1378_v19, %v480_v18 }
 0x172   : > { %v1606_v20 = vpop.eup %1605 }
 0x173   : > { %v481_v22 = vmul.f32 %v1606_v20, %v467_v9  ;;  %v496_v25 = vadd.f32 %v1379_v23, %v488_v21 }
 0x175   : > { %v489_v24 = vmul.f32 %v1378_v19, %v481_v22 }
 0x177   : > { %v497_v26 = vadd.f32 %v1379_v23, %v489_v24 }
 0x179   : > { %v498_v27 = vpack.c.bf16 %v497_v26, %v496_v25 }
 0x17b   : > { %499 = vst [vmem:[#allocation2] sm:$0xff] %v498_v27 }
 0x17c LB: >> { %v1793_v28 = vmov 0.0   ;;  %vm1794_vm0 = vmmov 0   ;;  %s1444_s22 = sshll.u32 %s1783_s14, 6  ;;  %s528_s16 = scalar_lea.vmem %s2150_s4, %s1783_s14  ;;  %vm629_vm1 = vcmask 261120   ;;  %vm677_vm2 = vcmask 130048   ;;  %v748_v16 = vld [vmem:[#allocation3] sm:$0xff]  ;;  %s1783_s14 = sphi %s1976_s14, %s507_s14  }
 0x17d   : >> { %1487 = vmatprep.subr.bf16.mxu0 %v1793_v28  ;;  %1503 = vmatprep.mubr.msk.bf16.mxu0 %vm1794_vm0, %v1793_v28  ;;  %s511_s17 = scalar_lea.vmem %s2149_s3, %s1444_s22  ;;  %v1382_v38 = vld [vmem:[%s528_s16] ss:$0 sm:$0xff]  ;;  %s1795_s22 = smov 96   ;;  %v749_v18 = vld [vmem:[#allocation3 + $0x8] sm:$0xff] }
 0x17e   : >> { %1507 = vmatprep.subr.bf16.mxu1 %v1793_v28  ;;  %1509 = vmatprep.mubr.msk.bf16.mxu1 %vm1794_vm0, %v1793_v28  ;;  %v1607_v29 = vld [vmem:[%s511_s17] sm:$0xff]   ;;  %v1608_v30 = vld [vmem:[%s511_s17 + $0x8] sm:$0xff]   ;;  %v1609_v31 = vld [vmem:[%s511_s17 + $0x10] sm:$0xff]   ;;  %s1796_s23 = smov 64   ;;  %s1445_s21 = sshll.u32 %s1783_s14, 4 }
 0x17f   : >> { %1488 = vmatpush3.bf16.msra.mxu0 %v1607_v29  ;;  %v1610_v32 = vld [vmem:[%s511_s17 + $0x18] sm:$0xff]   ;;  %v1611_v33 = vld [vmem:[%s511_s17 + $0x20] sm:$0xff]   ;;  %v1612_v34 = vld [vmem:[%s511_s17 + $0x28] sm:$0xff]   ;;  %s753_s30 = scalar_lea.vmem %s2151_s5, %s1445_s21  ;;  %s507_s14 = sadd.s32 1, %s1783_s14  }
 0x180   : >> { %1489 = vmatprep.subr.bf16.mxu0 %v1793_v28  ;;  %v1613_v35 = vld [vmem:[%s511_s17 + $0x30] sm:$0xff]   ;;  %v1614_v36 = vld [vmem:[%s511_s17 + $0x38] sm:$0xff]   ;;  %v1615_v8 = vld [vmem:[%s753_s30] sm:$0xff]   ;;  %p504_p6 = scmp.ge.s32.totalorder %s507_s14, 4  }
 0x181   : >> { %v1616_v10 = vld [vmem:[%s753_s30 + $0x8] sm:$0xff]   ;;  %v818_v24 = vld [vmem:[%s1961_s20] sm:$0xff] (%p504_p6)  ;;  %s2037_s17 = smov (%p504_p6), 0  }
 0x182   : >> { %v508_v37 = vld [vmem:[#allocation2] sm:$0xff] }
 0x183   : >> { %1490 = vmatpush3.bf16.msra.mxu0 %v1608_v30  ;;  %v1398_v26 = vld [vmem:[%s2152_s6] ss:$0 sm:$0xff] (%p504_p6) }
 0x184   : >> { %1491 = vmatprep.subr.bf16.mxu0 %v1793_v28 }
 0x187   : >> { %1492 = vmatpush3.bf16.msra.mxu0 %v1609_v31 }
 0x188   : >> { %1493 = vmatprep.subr.bf16.mxu0 %v1793_v28 }
 0x18b   : >> { %1494 = vmatpush3.bf16.msra.mxu0 %v1610_v32 }
 0x18c   : >> { %1495 = vmatprep.subr.bf16.mxu0 %v1793_v28 }
 0x18f   : >> { %1496 = vmatpush3.bf16.msra.mxu0 %v1611_v33 }
 0x190   : >> { %1497 = vmatprep.subr.bf16.mxu0 %v1793_v28 }
 0x193   : >> { %1498 = vmatpush3.bf16.msra.mxu0 %v1612_v34 }
 0x194   : >> { %1499 = vmatprep.subr.bf16.mxu0 %v1793_v28 }
 0x197   : >> { %1500 = vmatpush3.bf16.msra.mxu0 %v1613_v35 }
 0x198   : >> { %1501 = vmatprep.subr.bf16.mxu0 %v1793_v28 }
 0x19b   : >> { %1502 = vmatpush3.bf16.msra.mxu0 %v1614_v36 }
 0x19e   : >> { %1504 = vmatmul.mubr.bf16.vlgmr.msra.gmra.mrb[0].mxu0 %v508_v37 }
 0x271   : >> { %v618_v39 = vpop.f32.mrb[0].mxu0 }
 0x272   : >> { %v1505_v40 = vpop.f32.mrb[1].mxu0  ;;  %v619_v42 = vadd.f32 %v1382_v38, %v618_v39 }
 0x273   : >> { %v621_v41 = vpop.f32.mrb[2].mxu0 }
 0x274   : >> { %v622_v43 = vadd.f32 %v1382_v38, %v621_v41  ;;  %v1506_v44 = vpop.f32.mrb[3].mxu0 }
 0x276   : >> { %v625_v45 = vpack.c.bf16 %v622_v43, %v619_v42 }
 0x278   : >> { %627 = vrot.lane.b32.xlu0 %v625_v45, %s1795_s22 }
 0x2ea   : >> { %v628_v46 = vpop.permute.xlu0 %627 }
 0x2eb   : >> { %v634_v47 = vsel %vm629_vm1, %v628_v46, 0 }
 0x2ec   : >> { %1508 = vmatpush3.bf16.xpose.msra.mxu1 %v634_v47 }
 0x2ed   : >> { %1513 = vmatprep.subr.bf16.mxu1 %v1793_v28 }
 0x2f3   : >> { %1510 = vmatmul.mubr.msk.bf16.vlgmr.msra.gmra.mrb[0].mxu1 %vm629_vm1, %v625_v45 }
 0x2f4   : >> { %1515 = vmatprep.mubr.msk.bf16.mxu1 %vm1794_vm0, %v1793_v28 }
 0x3c6   : >> { %v670_v48 = vpop.f32.mrb[0].mxu1 }
 0x3c7   : >> { %v1511_v49 = vpop.f32.mrb[1].mxu1  ;;  %v678_v50 = vsel %vm677_vm2, %v670_v48, -inf }
 0x3c8   : >> { %679 = vmax.xlane.f32.xlu0 %v678_v50  ;;  %v673_v51 = vpop.f32.mrb[2].mxu1 }
 0x3c9   : >> { %v1512_v52 = vpop.f32.mrb[3].mxu1  ;;  %v681_v53 = vsel %vm677_vm2, %v673_v51, -inf }
 0x3ca   : >> { %682 = vmax.xlane.f32.xlu1 %v681_v53  ;;  %v1400_v52 = vld [vmem:[%s2154_s8] ss:$0 sm:$0xff] (%p504_p6) }
 0x455   : >> { %v680_v54 = vpop.xlane.xlu0 %679 }
 0x456   : >> { %v684_v55 = vsub.f32 %v670_v48, %v680_v54  ;;  %v1399_v48 = vld [vmem:[%s2153_s7] ss:$0 sm:$0xff] (%p504_p6) }
 0x457   : >> { %v683_v56 = vpop.xlane.xlu1 %682 }
 0x458   : >> { %v686_v57 = vmul.f32 1.442695, %v684_v55  ;;  %v685_v58 = vsub.f32 %v673_v51, %v683_v56 }
 0x45a   : >> { %1617 = vpow2.f32 %v686_v57  ;;  %v688_v59 = vmul.f32 1.442695, %v685_v58 }
 0x45c   : >> { %1619 = vpow2.f32 %v688_v59 }
 0x464   : >> { %v1618_v60 = vpop.eup %1617 }
 0x465   : >> { %v690_v61 = vsel %vm677_vm2, %v1618_v60, 0.0 }
 0x466   : >> { %v1620_v62 = vpop.eup %1619  ;;  %691 = vadd.xlane.f32.xlu1 %v690_v61 }
 0x467   : >> { %v693_v63 = vsel %vm677_vm2, %v1620_v62, 0.0 }
 0x46a   : >> { %694 = vadd.xlane.f32.xlu1 %v693_v63 }
 0x47b   : >> { %701 = vrot.lane.b32.xlu1 %v625_v45, %s1796_s23 }
 0x4f3   : >> { %v692_v1 = vpop.xlane.xlu1 %691 }
 0x4f4   : >> { %1621 = vrcp.f32 %v692_v1 }
 0x4f7   : >> { %v695_v2 = vpop.xlane.xlu1 %694 }
 0x4f8   : >> { %1623 = vrcp.f32 %v695_v2 }
 0x4fb   : >> { %v702_v3 = vpop.permute.xlu1 %701 }
 0x4fc   : >> { %1514 = vmatpush3.bf16.msra.mxu1 %v702_v3 }
 0x4fd   : >> { %1519 = vmatprep.subr.bf16.mxu1 %v1793_v28 }
 0x4fe   : >> { %v1622_v4 = vpop.eup %1621 }
 0x4ff   : >> { %v698_v6 = vmul.f32 %v1622_v4, %v1618_v60 }
 0x502   : >> { %v1624_v5 = vpop.eup %1623 }
 0x503   : >> { %v699_v7 = vmul.f32 %v1624_v5, %v1620_v62 }
 0x505   : >> { %v700_v9 = vpack.c.bf16 %v699_v7, %v698_v6 }
 0x507   : >> { %1516 = vmatmul.mubr.msk.bf16.vlgmr.msra.gmra.mrb[4].mxu1 %vm677_vm2, %v700_v9 }
 0x508   : >> { %1520 = vmatpush3.bf16.msra.mxu1 %v1615_v8  ;;  %1523 = vmatprep.mubr.msk.bf16.mxu1 %vm1794_vm0, %v1793_v28 }
 0x509   : >> { %1521 = vmatprep.subr.bf16.mxu1 %v1793_v28  ;;  %v819_v28 = vld [vmem:[%s1961_s20 + $0x8] sm:$0xff] (%p504_p6) }
 0x50c   : >> { %1522 = vmatpush3.bf16.msra.mxu1 %v1616_v10 }
 0x5da   : >> { %v741_v11 = vpop.f32.mrb[4].mxu1 }
 0x5db   : >> { %v1517_v12 = vpop.f32.mrb[5].mxu1 }
 0x5dc   : >> { %v744_v13 = vpop.f32.mrb[6].mxu1 }
 0x5dd   : >> { %v750_v14 = vpack.c.bf16 %v744_v13, %v741_v11  ;;  %v1518_v15 = vpop.f32.mrb[7].mxu1 }
 0x5df   : >> { %1524 = vmatmul.mubr.msk.bf16.vlgmr.msra.gmra.mrb[8].mxu1 %vm629_vm1, %v750_v14 }
 0x6b1   : > { %506 = sbr.rel (!%p504_p6) target bundleno = 380 (0x17c), region = 132 }
 0x6b2   : >> { %v807_v17 = vpop.f32.mrb[8].mxu1 }
 0x6b3   : >> { %v814_v19 = vadd.f32 %v807_v17, %v748_v16  ;;  %v1525_v20 = vpop.f32.mrb[9].mxu1 }
 0x6b4   : >> { %v810_v21 = vpop.f32.mrb[10].mxu1 }
 0x6b5   : >> { %816 = vst [vmem:[#allocation3] sm:$0xff] %v814_v19  ;;  %v815_v22 = vadd.f32 %v810_v21, %v749_v18  ;;  %v1526_v23 = vpop.f32.mrb[11].mxu1 }
 0x6b7   : >> { %817 = vst [vmem:[#allocation3 + $0x8] sm:$0xff] %v815_v22 }
 0x6bc   : > { %v820_v25 = vld [vmem:[#allocation3] sm:$0xff] }
 0x6bd   : > { %v822_v27 = vadd.f32 %v820_v25, %v818_v24  ;;  %879 = vst [vmem:[#allocation3] sm:$0xff] %v1792_v0 }
 0x6be   : > { %v821_v29 = vld [vmem:[#allocation3 + $0x8] sm:$0xff] }
 0x6bf   : > { %v823_v30 = vadd.f32 %v821_v29, %v819_v28  ;;  %880 = vst [vmem:[#allocation3 + $0x8] sm:$0xff] %v1792_v0  ;;  %v831_v31 = vadd.f32 %v1398_v26, %v822_v27 }
 0x6c1   : > { %v832_v32 = vadd.f32 %v1398_v26, %v823_v30  ;;  %833 = vst [vmem:[#allocation4] sm:$0xff] %v831_v31  ;;  %839 = vadd.xlane.f32.xlu0 %v831_v31 }
 0x6c3   : > { %834 = vst [vmem:[#allocation4 + $0x8] sm:$0xff] %v832_v32 }
 0x6c5   : > { %841 = vadd.xlane.f32.xlu0 %v832_v32 }
 0x74e   : > { %v840_v33 = vpop.xlane.xlu0 %839 }
 0x74f   : > { %v843_v34 = vmul.f32 0.0078125, %v840_v33 }
 0x751   : > { %v845_v35 = vsub.f32 %v831_v31, %v843_v34 }
 0x752   : > { %v842_v36 = vpop.xlane.xlu0 %841 }
 0x753   : > { %v844_v37 = vmul.f32 0.0078125, %v842_v36  ;;  %v847_v38 = vmul.f32 %v845_v35, %v845_v35 }
 0x755   : > { %v846_v39 = vsub.f32 %v832_v32, %v844_v37  ;;  %849 = vadd.xlane.f32.xlu1 %v847_v38 }
 0x757   : > { %v848_v40 = vmul.f32 %v846_v39, %v846_v39 }
 0x759   : > { %851 = vadd.xlane.f32.xlu1 %v848_v40 }
 0x7e2   : > { %v850_v41 = vpop.xlane.xlu1 %849 }
 0x7e3   : > { %v853_v42 = vmul.f32 0.0078125, %v850_v41 }
 0x7e5   : > { %v855_v43 = vadd.f32 1e-05, %v853_v42 }
 0x7e6   : > { %v852_v0 = vpop.xlane.xlu1 %851 }
 0x7e7   : > { %1625 = vrsqrt.f32 %v855_v43  ;;  %v854_v44 = vmul.f32 0.0078125, %v852_v0 }
 0x7e9   : > { %v856_v45 = vadd.f32 1e-05, %v854_v44 }
 0x7eb   : > { %1627 = vrsqrt.f32 %v856_v45 }
 0x7f1   : > { %v1626_v46 = vpop.eup %1625 }
 0x7f2   : > { %v859_v47 = vmul.f32 %v1626_v46, %v845_v35 }
 0x7f4   : > { %v867_v50 = vmul.f32 %v1399_v48, %v859_v47 }
 0x7f5   : > { %v1628_v49 = vpop.eup %1627 }
 0x7f6   : > { %v860_v51 = vmul.f32 %v1628_v49, %v846_v39  ;;  %v875_v54 = vadd.f32 %v1400_v52, %v867_v50 }
 0x7f8   : > { %v868_v53 = vmul.f32 %v1399_v48, %v860_v51 }
 0x7fa   : > { %v876_v55 = vadd.f32 %v1400_v52, %v868_v53 }
 0x7fc   : > { %v877_v56 = vpack.c.bf16 %v876_v55, %v875_v54 }
 0x7fe   : > { %878 = vst [vmem:[#allocation2] sm:$0xff] %v877_v56 }
 0x7ff LB: >> { %v1797_v57 = vmov 0   ;;  %s1446_s24 = sshll.u32 %s1787_s17, 7  ;;  %v911_v28 = vlaneseq  ;;  %s1403_s14 = sshll.u32 %s1787_s17, 1  ;;  %s1787_s17 = sphi %s2037_s17, %s886_s17  }
 0x800   : >> { %1033 = vmatprep.mubr.bf16.mxu0 %v1797_v57  ;;  %s2046_s22 = scalar_lea.vmem %s2155_s9, %s1446_s24  ;;  %s2057_s20 = scalar_lea.vmem [#allocation5], %s1446_s24 }
 0x801   : >> { %v1629_v58 = vld [vmem:[%s2046_s22 + $0x4] ss:$8 sps:$4 sm:$0xff]   ;;  %v1631_v59 = vld [vmem:[%s2046_s22] ss:$8 sps:$4 sm:$0xff]   ;;  %v1632_v60 = vld [vmem:[%s2046_s22 + $0x14] ss:$8 sps:$4 sm:$0xff]   ;;  %s908_s24 = scalar_lea.vmem %s2156_s10, %s1403_s14 }
 0x802   : >> { %1001 = vmatprep.subr.bf16.mxu0 %v1629_v58  ;;  %v1634_v61 = vld [vmem:[%s2046_s22 + $0x10] ss:$8 sps:$4 sm:$0xff]   ;;  %v1635_v62 = vld [vmem:[%s2046_s22 + $0x24] ss:$8 sps:$4 sm:$0xff]   ;;  %v1637_v63 = vld [vmem:[%s2046_s22 + $0x20] ss:$8 sps:$4 sm:$0xff]  }
 0x803   : >> { %1002 = vmatpush1.bf16.msra.mxu0 %v1631_v59  ;;  %v1638_v1 = vld [vmem:[%s2046_s22 + $0x34] ss:$8 sps:$4 sm:$0xff]   ;;  %v1640_v2 = vld [vmem:[%s2046_s22 + $0x30] ss:$8 sps:$4 sm:$0xff]   ;;  %v1641_v3 = vld [vmem:[%s2046_s22 + $0x44] ss:$8 sps:$4 sm:$0xff]  }
 0x804   : >> { %1003 = vmatprep.subr.bf16.mxu0 %v1632_v60  ;;  %v1653_v4 = vld [vmem:[%s2057_s20 + $0x40] sm:$0xff]   ;;  %v1655_v7 = vld [vmem:[%s2057_s20 + $0x48] sm:$0xff]   ;;  %v1644_v8 = vld [vmem:[%s2046_s22 + $0x54] ss:$8 sps:$4 sm:$0xff]   ;;  %v912_v29 = vshrl.u32 %v911_v28, 7  ;;  %s886_s17 = sadd.s32 1, %s1787_s17  }
 0x805   : >> { %v1654_v5 = vld [vmem:[%s2057_s20] sm:$0xff]   ;;  %1465 = vmatprep.subr.bf16.mxu1 %v1653_v4  ;;  %v1656_v9 = vld [vmem:[%s2057_s20 + $0x8] sm:$0xff]   ;;  %v1646_v10 = vld [vmem:[%s2046_s22 + $0x50] ss:$8 sps:$4 sm:$0xff]   ;;  %p883_p9 = scmp.ge.s32.totalorder %s886_s17, 2  }
 0x806   : >> { %v1643_v6 = vld [vmem:[%s2046_s22 + $0x40] ss:$8 sps:$4 sm:$0xff]   ;;  %1466 = vmatpush3.bf16.msra.mxu1 %v1654_v5  ;;  %v1647_v11 = vld [vmem:[%s2046_s22 + $0x64] ss:$8 sps:$4 sm:$0xff]   ;;  %v1650_v13 = vld [vmem:[%s2046_s22 + $0x74] ss:$8 sps:$4 sm:$0xff]  }
 0x807   : >> { %1004 = vmatpush1.bf16.msra.mxu0 %v1634_v61  ;;  %1467 = vmatprep.subr.bf16.mxu1 %v1655_v7  ;;  %v1649_v12 = vld [vmem:[%s2046_s22 + $0x60] ss:$8 sps:$4 sm:$0xff]   ;;  %v1652_v14 = vld [vmem:[%s2046_s22 + $0x70] ss:$8 sps:$4 sm:$0xff]   ;;  %v913_v30 = vsub.s32 0, %v912_v29  ;;  %v917_v32 = vsub.s32 1, %v912_v29 }
 0x808   : >> { %1005 = vmatprep.subr.bf16.mxu0 %v1635_v62  ;;  %v887_v15 = vld [vmem:[#allocation2] sm:$0xff]  ;;  %v1657_v16 = vld [vmem:[%s2057_s20 + $0x50] sm:$0xff]   ;;  %v1659_v18 = vld [vmem:[%s2057_s20 + $0x58] sm:$0xff]   ;;  %s1448_s22 = sshll.u32 (%p883_p9), %s1892_s29, 8  ;;  %s2105_s29 = scalar_lea.sflag (%p883_p9), [#allocation7], %s446_s15 }
 0x809   : >> { %v1658_v17 = vld [vmem:[%s2057_s20 + $0x10] sm:$0xff]   ;;  %v1660_v19 = vld [vmem:[%s2057_s20 + $0x18] sm:$0xff]   ;;  %v1661_v20 = vld [vmem:[%s2057_s20 + $0x60] sm:$0xff]   ;;  %s2097_s23 = scalar_lea.hbm (%p883_p9), %s2159_s13, %s1448_s22  ;;  %p2176_p12 = scmp.ne.s32.totalorder (%p883_p9), %s2169_s18, 0 }
 0x80a   : >> { %1468 = vmatpush3.bf16.msra.mxu1 %v1656_v9  ;;  %v1662_v21 = vld [vmem:[%s2057_s20 + $0x20] sm:$0xff]   ;;  %v1663_v22 = vld [vmem:[%s2057_s20 + $0x68] sm:$0xff]   ;;  %v1665_v24 = vld [vmem:[%s2057_s20 + $0x70] sm:$0xff]  }
 0x80b   : >> { %1006 = vmatpush1.bf16.msra.mxu0 %v1637_v63  ;;  %1469 = vmatprep.subr.bf16.mxu1 %v1657_v16  ;;  %v1664_v23 = vld [vmem:[%s2057_s20 + $0x28] sm:$0xff]   ;;  %v1666_v25 = vld [vmem:[%s2057_s20 + $0x30] sm:$0xff]   ;;  %v1667_v26 = vld [vmem:[%s2057_s20 + $0x78] sm:$0xff]  }
 0x80c   : >> { %1007 = vmatprep.subr.bf16.mxu0 %v1638_v1  ;;  %v1668_v27 = vld [vmem:[%s2057_s20 + $0x38] sm:$0xff]   ;;  %v909_v31 = vld [vmem:[%s908_s24] sm:$0x3]  ;;  %s1274_s20 = sshll.u32 (%p883_p9), %s1974_s27, 4  ;;  %s1798_s24 = smov (%p883_p9), [#allocation8]   ;;  %s2099_s20 = int_to_ptr.vmem [resolvable:$true] %s1274_s20 }
 0x80d   : >> { %v914_v33 = vrot.slane %v909_v31, %v913_v30  ;;  %v918_v34 = vrot.slane %v909_v31, %v917_v32  ;;  %s1705_s21 = scalar_lea.vmem (%p883_p9), %s2099_s20, 256  ;;  %s1709_s30 = sshll.u32 (%p883_p9), %s1798_s24, 4  ;;  %s1710_s30 = int_to_ptr.vmem [resolvable:$false] %s1709_s30 }
 0x80e   : >> { %1470 = vmatpush3.bf16.msra.mxu1 %v1658_v17  ;;  %p1706_p10 = scmp.ne.s32.totalorder (%p883_p9), %s2099_s20, %s1705_s21  ;;  %s1711_s16 = scalar_lea.vmem (%p883_p9), %s1710_s30, 512 }
 0x80f   : >> { %1008 = vmatpush1.bf16.msra.mxu0 %v1640_v2  ;;  %1471 = vmatprep.subr.bf16.mxu1 %v1659_v18  ;;  %v1064_v2 = vld [vmem:[#allocation3] sm:$0xff]  ;;  %p1712_p4 = scmp.lt.s32.totalorder (%p883_p9), %s2099_s20, %s1710_s30  ;;  %p1713_p7 = scmp.lt.s32.totalorder (%p883_p9), %s1711_s16, %s1705_s21 }
 0x810   : >> { %1009 = vmatprep.subr.bf16.mxu0 %v1641_v3  ;;  %p1707_p2 = pnand (%p883_p9), %p1706_p10, %p2176_p12 }
 0x811   : > { %p1714_p8 = por (%p883_p9), %p1713_p7, %p1712_p4 }
 0x812   : >> { %1472 = vmatpush3.bf16.msra.mxu1 %v1660_v19  ;;  %p1708_p3 = pneg (%p883_p9), %p1707_p2 }
 0x813   : >> { %1010 = vmatpush1.bf16.msra.mxu0 %v1643_v6  ;;  %1473 = vmatprep.subr.bf16.mxu1 %v1661_v20  ;;  %v1065_v6 = vld [vmem:[#allocation3 + $0x8] sm:$0xff] }
 0x814   : >> { %1011 = vmatprep.subr.bf16.mxu0 %v1644_v8  ;;  %p1715_p11 = pnand (%p883_p9), %p1714_p8, %p1708_p3 }
 0x816   : >> { %1474 = vmatpush3.bf16.msra.mxu1 %v1662_v21 }
 0x817   : >> { %1012 = vmatpush1.bf16.msra.mxu0 %v1646_v10  ;;  %1475 = vmatprep.subr.bf16.mxu1 %v1663_v22 }
 0x818   : >> { %1013 = vmatprep.subr.bf16.mxu0 %v1647_v11  ;;  %v1243_v11 = vld [vmem:[#allocation4] sm:$0xff] (%p883_p9) }
 0x81a   : >> { %1476 = vmatpush3.bf16.msra.mxu1 %v1664_v23 }
 0x81b   : >> { %1014 = vmatpush1.bf16.msra.mxu0 %v1649_v12  ;;  %1477 = vmatprep.subr.bf16.mxu1 %v1665_v24 }
 0x81c   : >> { %1015 = vmatprep.subr.bf16.mxu0 %v1650_v13  ;;  %v1437_v13 = vld [vmem:[%s2158_s12] ss:$0 sm:$0xff] (%p883_p9) }
 0x81e   : >> { %1478 = vmatpush3.bf16.msra.mxu1 %v1666_v25 }
 0x81f   : >> { %1016 = vmatpush1.bf16.msra.mxu0 %v1652_v14  ;;  %1479 = vmatprep.subr.bf16.mxu1 %v1667_v26 }
 0x822   : >> { %1034 = vmatmul.mubr.bf16.vlgmr.msra.gmra.mrb[0].mxu0 %v887_v15  ;;  %1480 = vmatpush3.bf16.msra.mxu1 %v1668_v27  ;;  %v1244_v15 = vld [vmem:[#allocation4 + $0x8] sm:$0xff] (%p883_p9) }
 0x8f5   : >> { %v1035_v35 = vpop.f32.mrb[0].mxu0 }
 0x8f6   : >> { %v1036_v36 = vadd.f32 %v1035_v35, %v914_v33  ;;  %v1037_v37 = vpop.f32.mrb[1].mxu0 }
 0x8f7   : >> { %v1038_v38 = vadd.f32 %v1037_v37, %v918_v34  ;;  %v1039_v39 = vpop.f32.mrb[2].mxu0 }
 0x8f8   : >> { %v1048_v40 = vmul.f32 0.70710677, %v1036_v36  ;;  %v1040_v41 = vadd.f32 %v1039_v39, %v914_v33  ;;  %v1041_v42 = vpop.f32.mrb[3].mxu0  ;;  %v1044_v52 = vmul.f32 0.5, %v1036_v36 }
 0x8f9   : >> { %v1049_v43 = vmul.f32 0.70710677, %v1038_v38  ;;  %v1042_v0 = vadd.f32 %v1041_v42, %v918_v34  ;;  %v1045_v55 = vmul.f32 0.5, %v1038_v38 }
 0x8fa   : >> { %1669 = verf.f32 %v1048_v40  ;;  %v1050_v44 = vmul.f32 0.70710677, %v1040_v41  ;;  %v1046_v53 = vmul.f32 0.5, %v1040_v41 }
 0x8fb   : >> { %1671 = verf.f32 %v1049_v43  ;;  %v1051_v45 = vmul.f32 0.70710677, %v1042_v0  ;;  %v1047_v56 = vmul.f32 0.5, %v1042_v0 }
 0x8fc   : >> { %1673 = verf.f32 %v1050_v44 }
 0x8fd   : >> { %1675 = verf.f32 %v1051_v45 }
 0x904   : >> { %v1670_v46 = vpop.eup %1669 }
 0x905   : >> { %v1672_v47 = vpop.eup %1671  ;;  %v1056_v48 = vadd.f32 1.0, %v1670_v46 }
 0x906   : >> { %v1674_v49 = vpop.eup %1673  ;;  %v1057_v50 = vadd.f32 1.0, %v1672_v47 }
 0x907   : >> { %v1676_v51 = vpop.eup %1675  ;;  %v1058_v54 = vadd.f32 1.0, %v1674_v49  ;;  %v1060_v58 = vmul.f32 %v1056_v48, %v1044_v52 }
 0x908   : >> { %v1059_v57 = vadd.f32 1.0, %v1676_v51  ;;  %v1061_v60 = vmul.f32 %v1057_v50, %v1045_v55 }
 0x909   : >> { %v1062_v59 = vmul.f32 %v1058_v54, %v1046_v53 }
 0x90a   : >> { %v1063_v61 = vmul.f32 %v1059_v57, %v1047_v56 }
 0x90b   : >> { %v1066_v62 = vpack.c.bf16 %v1062_v59, %v1060_v58 }
 0x90c   : >> { %v1067_v63 = vpack.c.bf16 %v1063_v61, %v1061_v60 }
 0x90e   : >> { %1230 = vmatprep.mubr.bf16.mxu1 %v1067_v63 }
 0x90f   : >> { %1231 = vmatmul.mubr.bf16.vlgmr.msra.gmra.mrb[0].mxu1 %v1066_v62 }
 0x9e2   : >> { %v1481_v1 = vpop.f32.mrb[0].mxu1 }
 0x9e3   : >> { %v1482_v3 = vpop.f32.mrb[1].mxu1 }
 0x9e4   : >> { %v1483_v4 = vadd.f32 %v1482_v3, %v1481_v1  ;;  %v1484_v5 = vpop.f32.mrb[2].mxu1  ;;  %885 = sbr.rel (!%p883_p9) target bundleno = 2047 (0x7ff), region = 143 }
 0x9e5   : >> { %v1485_v7 = vpop.f32.mrb[3].mxu1 }
 0x9e6   : >> { %v1239_v8 = vadd.f32 %v1483_v4, %v1064_v2  ;;  %v1486_v9 = vadd.f32 %v1485_v7, %v1484_v5 }
 0x9e8   : >> { %1241 = vst [vmem:[#allocation3] sm:$0xff] %v1239_v8  ;;  %v1240_v10 = vadd.f32 %v1486_v9, %v1065_v6 }
 0x9ea   : >> { %1242 = vst [vmem:[#allocation3 + $0x8] sm:$0xff] %v1240_v10 }
 0x9ef   : > { %v1245_v12 = vld [vmem:[#allocation3] sm:$0xff] }
 0x9f0   : > { %v1247_v14 = vadd.f32 %v1245_v12, %v1243_v11 }
 0x9f1   : > { %v1246_v16 = vld [vmem:[#allocation3 + $0x8] sm:$0xff] }
 0x9f2   : > { %v1248_v17 = vadd.f32 %v1246_v16, %v1244_v15  ;;  %v1256_v18 = vadd.f32 %v1437_v13, %v1247_v14 }
 0x9f4   : > { %v1257_v19 = vadd.f32 %v1437_v13, %v1248_v17  ;;  %1258 = vst [vmem:[%s1974_s27] sm:$0xff] %v1256_v18 }
 0x9f6   : > { %1259 = vst [vmem:[%s1974_s27 + $0x8] sm:$0xff] %v1257_v19 }
 0x9f7   : > { %1718 = shalt.err (!%p1715_p11)
}
 0x9f8   : > { %s1719_s15 = scalar_lea.hbm %s2097_s23, 256  ;;  %s1723_s17 = scalar_lea.hbm %s2159_s13, 512 }
 0x9f9   : > { %p1720_p13 = scmp.ne.s32.totalorder %s2097_s23, %s1719_s15  ;;  %p1724_p5 = scmp.lt.u32.totalorder %s2097_s23, %s2159_s13 }
 0x9fa   : > { %p1725_p6 = scmp.lt.u32.totalorder %s1723_s17, %s1719_s15  ;;  %p1727_p10 = scmp.lt.u32.totalorder %s1719_s15, %s2097_s23 }
 0x9fb   : > { %p1721_p1 = pnand %p1720_p13, %p2176_p12 }
 0x9fc   : > { %p1726_p9 = por %p1725_p6, %p1724_p5 }
 0x9fd   : > { %p1722_p0 = pneg %p1721_p1 }
 0x9fe   : > { %p1728_p2 = por %p1727_p10, %p1726_p9 }
 0xa00   : > { %p1729_p3 = pnand %p1728_p2, %p1722_p0 }
 0xa02   : > { %1732 = shalt.err (!%p1729_p3)
}
 0xa03   : > { %s1799_s21 = smov 128   ;;  %s1800_s30 = smov 8  }
 0xa04   : > { %1531 = dma.vmem_to_hbm [thread:$0]  (%p2176_p12), %s2099_s20, 256, %s2097_s23, %s2105_s29, %s1799_s21, %s1799_s21, %s1800_s30  }
 0xa05 PF: > { %p1543_p4 = scmp.ge.s32.totalorder %s1779_s28, 2  ;;  %s1289_s16 = sand.u32 1, %s1767_s25  }
 0xa06   : > { %p2177_p7 = scmp.ne.s32.totalorder %s2170_s19, 0  ;;  %s1290_s15 = scalar_lea.sflag [#allocation7], %s1289_s16 }
 0xa08   : > { %p1538_p8 = pnand %p1543_p4, %p2177_p7 }
 0xa0a   : > { %1762 = dma.done.wait (!%p1538_p8), %s1290_s15, 256  }
 0xa0b   : > { %1764 = vsyncadd (!%p1538_p8), %s1290_s15, 4294967040  ;;  %s2178_s28 = sld [smem:[#allocation12_spill]]  ;;  %s2179_s27 = sld [smem:[#allocation11_spill]] }
 0xa0c   : > { %s2180_s22 = sld [smem:[#allocation13_spill]]  ;;  %s2181_s25 = smov %s1771_s26 }
 0xa11   : > { %p24_p11 = scmp.ge.s32.totalorder %s2178_s28, 4   ;;  %s2182_s26 = smov %s2179_s27 }
 0xa12   : > { %s2183_s27 = smov %s2180_s22 }
 0xa13   :  { %26 = sbr.rel (!%p24_p11) target bundleno = 4 (0x4), region = 154 }
 0xa1a   :  { %1295 = vsyncpa [#allocation6], 1 }
 0xa1b   :  { %1297 = vsyncpa [#allocation6 + $0x1], 1 }
 0xa1c   :  { %1298 = vsyncpa [#allocation7], 1 }
 0xa1d   :  { %1300 = vsyncpa [#allocation7 + $0x1], 1 }

</bundles_post_ra>
